<compile_context>
chip_gen: v6e
topology: v6e:2x2x1
jax: 0.10.0
libtpu: 0.0.40
codegen_flags: <defaults>
</compile_context>

<pallas_src>
import jax
import jax.numpy as jnp
from jax import lax
from jax.experimental import pallas as pl
from jax.experimental.pallas import tpu as pltpu

EPS = 1e-5


# ----------------------- one-time structured operators -----------------------

def interp_matrix(n_in, n_out):
    """1-D bilinear interpolation matrix, align_corners=True (PyTorch)."""
    if n_in == 1:
        return jnp.ones((n_out, 1), jnp.float32)
    pos = jnp.arange(n_out, dtype=jnp.float32) * (n_in - 1) / (n_out - 1)
    lo = jnp.clip(jnp.floor(pos).astype(jnp.int32), 0, n_in - 2)
    frac = pos - lo.astype(jnp.float32)
    rows = jnp.arange(n_out)
    M = jnp.zeros((n_out, n_in), jnp.float32)
    M = M.at[rows, lo].set(1.0 - frac)
    M = M.at[rows, lo + 1].add(frac)
    return M


def shift_matrix(n, d):
    """S[i, j] = 1 iff j == i + d (out-of-range rows/cols are zero)."""
    i = jnp.arange(n)[:, None]
    j = jnp.arange(n)[None, :]
    return (j == i + d).astype(jnp.float32)


def build_operators(params, batch, height, width):
    """Precompute the small structured operands ONCE (outside the step jit)."""
    KH, KW, Ci, Co = params["w1"].shape
    pad = (KH - 1) // 2
    Ho, Wo = 2 * height, 2 * width
    Lout = Wo * Co
    f32, bf16 = jnp.float32, jnp.bfloat16
    hi = lax.Precision.HIGHEST

    Mh = interp_matrix(height, Ho)                     # (Ho, H)
    MwT = interp_matrix(width, Wo).T                   # (W, Wo)
    # Row-upsample operator, block-diagonal over the batch.
    # TODO(synk): replace the batch kron by a grid axis over N at production sizes.
    uh = jnp.kron(jnp.eye(batch, dtype=f32), Mh)       # (N*Ho, N*H)

    def mm(a, b):
        return jnp.matmul(a, b, precision=hi)

    # conv1 right operand with the W-upsample folded in; KH taps stacked along K.
    r1 = [sum(jnp.kron(mm(MwT, shift_matrix(Wo, pad - kw)), params["w1"][kh, kw])
              for kw in range(KW)) for kh in range(KH)]
    r1cat = jnp.concatenate(r1, axis=0)                # (KH*W*Ci, Wo*Co)
    # conv2 right operand (pure W-shift kron); KH taps stacked along K.
    a2 = [sum(jnp.kron(shift_matrix(Wo, pad - kw), params["w2"][kh, kw])
              for kw in range(KW)) for kh in range(KH)]
    a2cat = jnp.concatenate(a2, axis=0)                # (KH*Wo*Co, Wo*Co)

    # Skinny BN per-channel reduce / broadcast matrices (Lout x Co, Co x Lout).
    kr = jnp.kron(jnp.ones((Wo, 1), f32), jnp.eye(Co, dtype=f32))
    bc = jnp.kron(jnp.ones((1, Wo), f32), jnp.eye(Co, dtype=f32))

    def lanes(v):                                      # (Co,) -> (1, Wo*Co)
        return jnp.tile(v.astype(f32), Wo).reshape(1, Lout)

    return dict(uh=uh.astype(bf16), r1=r1cat.astype(bf16), a2=a2cat.astype(bf16),
                b1=lanes(params["b1"]), g1=lanes(params["g1"]), be1=lanes(params["be1"]),
                b2=lanes(params["b2"]), g2=lanes(params["g2"]), be2=lanes(params["be2"]),
                kr=kr, bc=bc)


# --------------------------------- the kernel ---------------------------------

def _make_kernel(n_rows, Ho, KH, pad, Lin, Lout, inv_count):
    f32, bf16 = jnp.float32, jnp.bfloat16

    def kernel(x_ref, uh_ref, r1_ref, b1_ref, g1_ref, be1_ref,
               a2_ref, b2_ref, g2_ref, be2_ref, kr_ref, bc_ref,
               o_ref, pad1_ref, cat1_ref, pad2_ref, cat2_ref):
        # Per-row "height within sample" index, used to zero the conv halo rows.
        row = lax.broadcasted_iota(jnp.int32, (n_rows, 1), 0)
        hin = row % Ho

        def taps(val, pad_ref, cat_ref, width):
            """Write the KH row-shifted copies of `val` (zero-padded per sample)
            side by side into cat_ref -> one K-concatenated matmul operand."""
            if pad > 0:
                pad_ref[0:pad, :] = jnp.zeros((pad, width), f32)
                pad_ref[pad + n_rows:pad + n_rows + pad, :] = jnp.zeros((pad, width), f32)
            pad_ref[pad:pad + n_rows, :] = val
            for kh in range(KH):
                d = kh - pad
                sh = pad_ref[kh:kh + n_rows, :]
                if d != 0:
                    valid = jnp.logical_and(hin + d >= 0, hin + d < Ho)
                    sh = sh * valid.astype(f32)
                cat_ref[:, kh * width:(kh + 1) * width] = sh
            return cat_ref[...].astype(bf16)

        def bn_relu(y, g, be):
            # BatchNorm2d training-mode batch stats (biased var), two-pass, f32.
            mean_c = jnp.dot(jnp.sum(y, axis=0, keepdims=True), kr_ref[...],
                             preferred_element_type=f32) * inv_count        # (1, Co)
            mean = jnp.dot(mean_c, bc_ref[...], preferred_element_type=f32)  # (1, L)
            yc = y - mean
            var_c = jnp.dot(jnp.sum(yc * yc, axis=0, keepdims=True), kr_ref[...],
                            preferred_element_type=f32) * inv_count          # (1, Co)
            inv = jnp.dot(lax.rsqrt(var_c + EPS), bc_ref[...],
                          preferred_element_type=f32)                        # (1, L)
            return jnp.maximum(yc * inv * g + be, 0.0)

        # x2 bilinear upsample along H (single matmul); the W-upsample lives in r1.
        xu = jnp.dot(uh_ref[...], x_ref[...], preferred_element_type=f32)

        # conv1: one (rows, KH*Lin) @ (KH*Lin, Lout) matmul over the tap-concat.
        y1 = jnp.dot(taps(xu, pad1_ref, cat1_ref, Lin), r1_ref[...],
                     preferred_element_type=f32) + b1_ref[...]
        y1 = bn_relu(y1, g1_ref[...], be1_ref[...])

        # conv2: one (rows, KH*Lout) @ (KH*Lout, Lout) matmul over the tap-concat.
        y2 = jnp.dot(taps(y1, pad2_ref, cat2_ref, Lout), a2_ref[...],
                     preferred_element_type=f32) + b2_ref[...]
        o_ref[...] = bn_relu(y2, g2_ref[...], be2_ref[...])

    return kernel


# ------------------------------ UpBlock forward ------------------------------

@jax.jit
def up_block_forward(x_nchw, ops):
    N, Ci, H, W = x_nchw.shape
    Lin = W * Ci
    KH = ops["r1"].shape[0] // Lin
    pad = (KH - 1) // 2
    Ho, Wo = 2 * H, 2 * W
    Lout = ops["r1"].shape[1]
    Co = Lout // Wo
    Rin, Rout = N * H, N * Ho
    f32, bf16 = jnp.float32, jnp.bfloat16

    # NCHW -> lane-dense (N*H, W*Ci) slab, bf16 (halves the input DMA).
    x2d = jnp.transpose(x_nchw, (0, 2, 3, 1)).reshape(Rin, Lin).astype(bf16)

    full = lambda shape: pl.BlockSpec(shape, lambda i: (0,) * len(shape))
    kernel = _make_kernel(Rout, Ho, KH, pad, Lin, Lout, 1.0 / (N * Ho * Wo))

    out2d = pl.pallas_call(
        kernel,
        grid=(1,),
        in_specs=[full((Rin, Lin)),
                  full((Rout, Rin)), full((KH * Lin, Lout)),
                  full((1, Lout)), full((1, Lout)), full((1, Lout)),
                  full((KH * Lout, Lout)),
                  full((1, Lout)), full((1, Lout)), full((1, Lout)),
                  full((Lout, Co)), full((Co, Lout))],
        out_specs=full((Rout, Lout)),
        out_shape=jax.ShapeDtypeStruct((Rout, Lout), f32),
        scratch_shapes=[pltpu.VMEM((Rout + 2 * pad, Lin), f32),    # H-padded conv1 input
                        pltpu.VMEM((Rout, KH * Lin), f32),         # conv1 tap-concat
                        pltpu.VMEM((Rout + 2 * pad, Lout), f32),   # H-padded conv2 input
                        pltpu.VMEM((Rout, KH * Lout), f32)],       # conv2 tap-concat
        compiler_params=pltpu.CompilerParams(
            dimension_semantics=("arbitrary",)),
    )(x2d, ops["uh"], ops["r1"], ops["b1"], ops["g1"], ops["be1"],
      ops["a2"], ops["b2"], ops["g2"], ops["be2"], ops["kr"], ops["bc"])

    out = out2d.reshape(N, Ho, Wo, Co)
    return jnp.transpose(out, (0, 3, 1, 2))              # NHWC -> NCHW


def init_params(key, in_channels, out_channels, kernel_size):
    k1, k2, k3, k4 = jax.random.split(key, 4)
    w1 = 0.1 * jax.random.normal(
        k1, (kernel_size, kernel_size, in_channels, out_channels), jnp.float32)
    b1 = 0.1 * jax.random.normal(k2, (out_channels,), jnp.float32)
    w2 = 0.1 * jax.random.normal(
        k3, (kernel_size, kernel_size, out_channels, out_channels), jnp.float32)
    b2 = 0.1 * jax.random.normal(k4, (out_channels,), jnp.float32)
    ones = jnp.ones((out_channels,), jnp.float32)
    zeros = jnp.zeros((out_channels,), jnp.float32)
    return dict(w1=w1, b1=b1, g1=ones, be1=zeros,
                w2=w2, b2=b2, g2=ones, be2=zeros)


# ---------------------------- pure-JAX reference ----------------------------

def reference_forward(x_nchw, p, kernel_size):
    x = jnp.transpose(x_nchw, (0, 2, 3, 1)).astype(jnp.float32)
    N, H, W, C = x.shape
    Mh = interp_matrix(H, 2 * H)
    Mw = interp_matrix(W, 2 * W)
    x = jnp.einsum('oh,nhwc->nowc', Mh, x, precision=lax.Precision.HIGHEST)
    x = jnp.einsum('pw,nowc->nopc', Mw, x, precision=lax.Precision.HIGHEST)
    pad = (kernel_size - 1) // 2

    def conv_bn_relu(x, w, b, g, be):
        y = lax.conv_general_dilated(
            x, w, window_strides=(1, 1), padding=((pad, pad), (pad, pad)),
            dimension_numbers=('NHWC', 'HWIO', 'NHWC'),
            precision=lax.Precision.HIGHEST) + b
        mean = jnp.mean(y, axis=(0, 1, 2), keepdims=True)
        var = jnp.mean((y - mean) ** 2, axis=(0, 1, 2), keepdims=True)
        y = (y - mean) * lax.rsqrt(var + EPS) * g + be
        return jnp.maximum(y, 0.0)

    x = conv_bn_relu(x, p["w1"], p["b1"], p["g1"], p["be1"])
    x = conv_bn_relu(x, p["w2"], p["b2"], p["g2"], p["be2"])
    return jnp.transpose(x, (0, 3, 1, 2))


# ----------------------------------- main -----------------------------------

if __name__ == "__main__":
    batch = 2
    in_channels = 4
    out_channels = 8
    input_size = 16         # spatial size before the x2 upsample
    kernel_size = 3         # 'same' padding = (k-1)//2 = 1

    key = jax.random.PRNGKey(0)
    kx, kp = jax.random.split(key)
    x = jax.random.normal(kx, (batch, in_channels, input_size, input_size),
                          jnp.float32)
    params = init_params(kp, in_channels, out_channels, kernel_size)

    ops = build_operators(params, batch, input_size, input_size)   # one-time setup
    out = jax.block_until_ready(up_block_forward(x, ops))
    assert out.shape == (batch, out_channels, 2 * input_size, 2 * input_size)

    ref = reference_forward(x, params, kernel_size)
    # bf16 matmul operands (f32 accumulation) -> relaxed tolerance.
    max_err = float(jnp.max(jnp.abs(out - ref)))
    assert jnp.allclose(out, ref, atol=4e-2, rtol=4e-2), max_err

    print("KERNEL_OK")
</pallas_src>

<mosaic_0001>
module attributes {stable_mosaic.version = 11 : i64} {
  func.func @kernel(%arg0: i32, %arg1: memref<32x64xbf16, #tpu.memory_space<vmem>>, %arg2: memref<64x32xbf16, #tpu.memory_space<vmem>>, %arg3: memref<192x256xbf16, #tpu.memory_space<vmem>>, %arg4: memref<1x256xf32, #tpu.memory_space<vmem>>, %arg5: memref<1x256xf32, #tpu.memory_space<vmem>>, %arg6: memref<1x256xf32, #tpu.memory_space<vmem>>, %arg7: memref<768x256xbf16, #tpu.memory_space<vmem>>, %arg8: memref<1x256xf32, #tpu.memory_space<vmem>>, %arg9: memref<1x256xf32, #tpu.memory_space<vmem>>, %arg10: memref<1x256xf32, #tpu.memory_space<vmem>>, %arg11: memref<256x8xf32, #tpu.memory_space<vmem>>, %arg12: memref<8x256xf32, #tpu.memory_space<vmem>>, %arg13: memref<64x256xf32, #tpu.memory_space<vmem>>, %arg14: memref<66x64xf32, #tpu.memory_space<vmem>>, %arg15: memref<64x192xf32, #tpu.memory_space<vmem>>, %arg16: memref<66x256xf32, #tpu.memory_space<vmem>>, %arg17: memref<64x768xf32, #tpu.memory_space<vmem>>) attributes {dimension_semantics = [#tpu.dimension_semantics<arbitrary>], iteration_bounds = array<i64: 1>, scalar_prefetch = 0 : i64, scratch_operands = 4 : i64, tpu.core_type = #tpu.core_type<tc>, window_params = [{pipeline_mode = #tpu.pipeline_mode<synchronous>, transform_indices = @transform_0, window_bounds = array<i64: 32, 64>}, {pipeline_mode = #tpu.pipeline_mode<synchronous>, transform_indices = @transform_1, window_bounds = array<i64: 64, 32>}, {pipeline_mode = #tpu.pipeline_mode<synchronous>, transform_indices = @transform_2, window_bounds = array<i64: 192, 256>}, {pipeline_mode = #tpu.pipeline_mode<synchronous>, transform_indices = @transform_3, window_bounds = array<i64: 1, 256>}, {pipeline_mode = #tpu.pipeline_mode<synchronous>, transform_indices = @transform_4, window_bounds = array<i64: 1, 256>}, {pipeline_mode = #tpu.pipeline_mode<synchronous>, transform_indices = @transform_5, window_bounds = array<i64: 1, 256>}, {pipeline_mode = #tpu.pipeline_mode<synchronous>, transform_indices = @transform_6, window_bounds = array<i64: 768, 256>}, {pipeline_mode = #tpu.pipeline_mode<synchronous>, transform_indices = @transform_7, window_bounds = array<i64: 1, 256>}, {pipeline_mode = #tpu.pipeline_mode<synchronous>, transform_indices = @transform_8, window_bounds = array<i64: 1, 256>}, {pipeline_mode = #tpu.pipeline_mode<synchronous>, transform_indices = @transform_9, window_bounds = array<i64: 1, 256>}, {pipeline_mode = #tpu.pipeline_mode<synchronous>, transform_indices = @transform_10, window_bounds = array<i64: 256, 8>}, {pipeline_mode = #tpu.pipeline_mode<synchronous>, transform_indices = @transform_11, window_bounds = array<i64: 8, 256>}, {pipeline_mode = #tpu.pipeline_mode<synchronous>, transform_indices = @transform_12, window_bounds = array<i64: 64, 256>}]} {
    %0 = tpu.iota {dimensions = array<i32: 0>} : vector<64x1xi32>
    %c32_i32 = arith.constant 32 : i32
    %c0_i32 = arith.constant 0 : i32
    %1 = arith.cmpi eq, %c32_i32, %c0_i32 : i32
    %c1_i32 = arith.constant 1 : i32
    %2 = arith.select %1, %c1_i32, %c32_i32 : i32
    %3 = vector.broadcast %2 : i32 to vector<64x1xi32>
    %4 = arith.remsi %0, %3 : vector<64x1xi32>
    %c0_i32_0 = arith.constant 0 : i32
    %5 = vector.broadcast %c0_i32_0 : i32 to vector<64x1xi32>
    %6 = arith.cmpi ne, %4, %5 : vector<64x1xi32>
    %c0_i32_1 = arith.constant 0 : i32
    %7 = vector.broadcast %c0_i32_1 : i32 to vector<64x1xi32>
    %8 = arith.cmpi slt, %4, %7 : vector<64x1xi32>
    %c0_i32_2 = arith.constant 0 : i32
    %9 = arith.cmpi slt, %2, %c0_i32_2 : i32
    %10 = vector.broadcast %9 : i1 to vector<64x1xi1>
    %11 = vector.broadcast %10 : vector<64x1xi1> to vector<64x1xi1>
    %12 = arith.xori %8, %11 : vector<64x1xi1>
    %13 = arith.andi %12, %6 : vector<64x1xi1>
    %14 = vector.broadcast %2 : i32 to vector<64x1xi32>
    %15 = arith.addi %4, %14 : vector<64x1xi32>
    %16 = arith.select %13, %15, %4 : vector<64x1xi1>, vector<64x1xi32>
    %c0 = arith.constant 0 : index
    %c0_3 = arith.constant 0 : index
    %17 = vector.load %arg2[%c0, %c0_3] : memref<64x32xbf16, #tpu.memory_space<vmem>>, vector<64x32xbf16>
    %c0_4 = arith.constant 0 : index
    %c0_5 = arith.constant 0 : index
    %18 = vector.load %arg1[%c0_4, %c0_5] : memref<32x64xbf16, #tpu.memory_space<vmem>>, vector<32x64xbf16>
    %cst = arith.constant dense<0.000000e+00> : vector<64x64xf32>
    %19 = tpu.matmul %17, %18, %cst {dimension_numbers = #tpu.dot_dimension_numbers<[1], [0], [0], [1], [0, 0, 1, 1], [], []>} : vector<64x32xbf16>, vector<32x64xbf16>, vector<64x64xf32> -> vector<64x64xf32>
    %cst_6 = arith.constant 0.000000e+00 : f32
    %20 = vector.broadcast %cst_6 : f32 to vector<1x64xf32>
    %c0_7 = arith.constant 0 : index
    %c0_8 = arith.constant 0 : index
    %21 = vector.load %arg14[%c0_7, %c0_8] : memref<66x64xf32, #tpu.memory_space<vmem>>, vector<1x64xf32>
    tpu.vector_store %arg14[%c0_7, %c0_8], %20 {strides = array<i32>} : memref<66x64xf32, #tpu.memory_space<vmem>>, vector<1x64xf32>,
    %cst_9 = arith.constant 0.000000e+00 : f32
    %22 = vector.broadcast %cst_9 : f32 to vector<1x64xf32>
    %c65 = arith.constant 65 : index
    %c0_10 = arith.constant 0 : index
    %23 = vector.load %arg14[%c65, %c0_10] : memref<66x64xf32, #tpu.memory_space<vmem>>, vector<1x64xf32>
    tpu.vector_store %arg14[%c65, %c0_10], %22 {strides = array<i32>} : memref<66x64xf32, #tpu.memory_space<vmem>>, vector<1x64xf32>,
    %c1 = arith.constant 1 : index
    %c0_11 = arith.constant 0 : index
    %24 = vector.load %arg14[%c1, %c0_11] : memref<66x64xf32, #tpu.memory_space<vmem>>, vector<64x64xf32>
    tpu.vector_store %arg14[%c1, %c0_11], %19 {strides = array<i32>} : memref<66x64xf32, #tpu.memory_space<vmem>>, vector<64x64xf32>,
    %c0_12 = arith.constant 0 : index
    %c0_13 = arith.constant 0 : index
    %25 = vector.load %arg14[%c0_12, %c0_13] : memref<66x64xf32, #tpu.memory_space<vmem>>, vector<64x64xf32>
    %c-1_i32 = arith.constant -1 : i32
    %26 = vector.broadcast %c-1_i32 : i32 to vector<64x1xi32>
    %27 = arith.addi %16, %26 : vector<64x1xi32>
    %c0_i32_14 = arith.constant 0 : i32
    %28 = vector.broadcast %c0_i32_14 : i32 to vector<64x1xi32>
    %29 = arith.cmpi sge, %27, %28 : vector<64x1xi32>
    %c-1_i32_15 = arith.constant -1 : i32
    %30 = vector.broadcast %c-1_i32_15 : i32 to vector<64x1xi32>
    %31 = arith.addi %16, %30 : vector<64x1xi32>
    %c32_i32_16 = arith.constant 32 : i32
    %32 = vector.broadcast %c32_i32_16 : i32 to vector<64x1xi32>
    %33 = arith.cmpi slt, %31, %32 : vector<64x1xi32>
    %34 = arith.andi %29, %33 : vector<64x1xi1>
    %35 = arith.extui %34 : vector<64x1xi1> to vector<64x1xi32>
    %36 = arith.sitofp %35 : vector<64x1xi32> to vector<64x1xf32>
    %37 = vector.broadcast %36 : vector<64x1xf32> to vector<64x64xf32>
    %38 = arith.mulf %25, %37 : vector<64x64xf32>
    %c0_17 = arith.constant 0 : index
    %c0_18 = arith.constant 0 : index
    %39 = vector.load %arg15[%c0_17, %c0_18] : memref<64x192xf32, #tpu.memory_space<vmem>>, vector<64x64xf32>
    tpu.vector_store %arg15[%c0_17, %c0_18], %38 {strides = array<i32>} : memref<64x192xf32, #tpu.memory_space<vmem>>, vector<64x64xf32>,
    %c1_19 = arith.constant 1 : index
    %c0_20 = arith.constant 0 : index
    %40 = vector.load %arg14[%c1_19, %c0_20] : memref<66x64xf32, #tpu.memory_space<vmem>>, vector<64x64xf32>
    %c0_21 = arith.constant 0 : index
    %c64 = arith.constant 64 : index
    %41 = vector.load %arg15[%c0_21, %c64] : memref<64x192xf32, #tpu.memory_space<vmem>>, vector<64x64xf32>
    tpu.vector_store %arg15[%c0_21, %c64], %40 {strides = array<i32>} : memref<64x192xf32, #tpu.memory_space<vmem>>, vector<64x64xf32>,
    %c2 = arith.constant 2 : index
    %c0_22 = arith.constant 0 : index
    %42 = vector.load %arg14[%c2, %c0_22] : memref<66x64xf32, #tpu.memory_space<vmem>>, vector<64x64xf32>
    %c1_i32_23 = arith.constant 1 : i32
    %43 = vector.broadcast %c1_i32_23 : i32 to vector<64x1xi32>
    %44 = arith.addi %16, %43 : vector<64x1xi32>
    %c0_i32_24 = arith.constant 0 : i32
    %45 = vector.broadcast %c0_i32_24 : i32 to vector<64x1xi32>
    %46 = arith.cmpi sge, %44, %45 : vector<64x1xi32>
    %c1_i32_25 = arith.constant 1 : i32
    %47 = vector.broadcast %c1_i32_25 : i32 to vector<64x1xi32>
    %48 = arith.addi %16, %47 : vector<64x1xi32>
    %c32_i32_26 = arith.constant 32 : i32
    %49 = vector.broadcast %c32_i32_26 : i32 to vector<64x1xi32>
    %50 = arith.cmpi slt, %48, %49 : vector<64x1xi32>
    %51 = arith.andi %46, %50 : vector<64x1xi1>
    %52 = arith.extui %51 : vector<64x1xi1> to vector<64x1xi32>
    %53 = arith.sitofp %52 : vector<64x1xi32> to vector<64x1xf32>
    %54 = vector.broadcast %53 : vector<64x1xf32> to vector<64x64xf32>
    %55 = arith.mulf %42, %54 : vector<64x64xf32>
    %c0_27 = arith.constant 0 : index
    %c128 = arith.constant 128 : index
    %56 = vector.load %arg15[%c0_27, %c128] : memref<64x192xf32, #tpu.memory_space<vmem>>, vector<64x64xf32>
    tpu.vector_store %arg15[%c0_27, %c128], %55 {strides = array<i32>} : memref<64x192xf32, #tpu.memory_space<vmem>>, vector<64x64xf32>,
    %c0_28 = arith.constant 0 : index
    %c0_29 = arith.constant 0 : index
    %57 = vector.load %arg15[%c0_28, %c0_29] : memref<64x192xf32, #tpu.memory_space<vmem>>, vector<64x192xf32>
    %58 = arith.truncf %57 : vector<64x192xf32> to vector<64x192xbf16>
    %c0_30 = arith.constant 0 : index
    %c0_31 = arith.constant 0 : index
    %59 = vector.load %arg3[%c0_30, %c0_31] : memref<192x256xbf16, #tpu.memory_space<vmem>>, vector<192x256xbf16>
    %cst_32 = arith.constant dense<0.000000e+00> : vector<64x256xf32>
    %60 = tpu.matmul %58, %59, %cst_32 {dimension_numbers = #tpu.dot_dimension_numbers<[1], [0], [0], [1], [0, 0, 1, 1], [], []>} : vector<64x192xbf16>, vector<192x256xbf16>, vector<64x256xf32> -> vector<64x256xf32>
    %c0_33 = arith.constant 0 : index
    %c0_34 = arith.constant 0 : index
    %61 = vector.load %arg4[%c0_33, %c0_34] : memref<1x256xf32, #tpu.memory_space<vmem>>, vector<1x256xf32>
    %62 = vector.broadcast %61 : vector<1x256xf32> to vector<64x256xf32>
    %63 = arith.addf %60, %62 : vector<64x256xf32>
    %c0_35 = arith.constant 0 : index
    %c0_36 = arith.constant 0 : index
    %64 = vector.load %arg5[%c0_35, %c0_36] : memref<1x256xf32, #tpu.memory_space<vmem>>, vector<1x256xf32>
    %c0_37 = arith.constant 0 : index
    %c0_38 = arith.constant 0 : index
    %65 = vector.load %arg6[%c0_37, %c0_38] : memref<1x256xf32, #tpu.memory_space<vmem>>, vector<1x256xf32>
    %cst_39 = arith.constant dense<0.000000e+00> : vector<256xf32>
    %66 = vector.multi_reduction <add>, %63, %cst_39 [0] : vector<64x256xf32> to vector<256xf32>
    %67 = vector.shape_cast %66 : vector<256xf32> to vector<1x256xf32>
    %c0_40 = arith.constant 0 : index
    %c0_41 = arith.constant 0 : index
    %68 = vector.load %arg11[%c0_40, %c0_41] : memref<256x8xf32, #tpu.memory_space<vmem>>, vector<256x8xf32>
    %cst_42 = arith.constant dense<0.000000e+00> : vector<1x8xf32>
    %69 = tpu.matmul %67, %68, %cst_42 {dimension_numbers = #tpu.dot_dimension_numbers<[1], [0], [0], [1], [0, 0, 1, 1], [], []>} : vector<1x256xf32>, vector<256x8xf32>, vector<1x8xf32> -> vector<1x8xf32>
    %cst_43 = arith.constant 4.8828125E-4 : f32
    %70 = vector.broadcast %cst_43 : f32 to vector<1x8xf32>
    %71 = arith.mulf %69, %70 : vector<1x8xf32>
    %c0_44 = arith.constant 0 : index
    %c0_45 = arith.constant 0 : index
    %72 = vector.load %arg12[%c0_44, %c0_45] : memref<8x256xf32, #tpu.memory_space<vmem>>, vector<8x256xf32>
    %cst_46 = arith.constant dense<0.000000e+00> : vector<1x256xf32>
    %73 = tpu.matmul %71, %72, %cst_46 {dimension_numbers = #tpu.dot_dimension_numbers<[1], [0], [0], [1], [0, 0, 1, 1], [], []>} : vector<1x8xf32>, vector<8x256xf32>, vector<1x256xf32> -> vector<1x256xf32>
    %74 = vector.broadcast %73 : vector<1x256xf32> to vector<64x256xf32>
    %75 = arith.subf %63, %74 : vector<64x256xf32>
    %76 = arith.mulf %75, %75 : vector<64x256xf32>
    %cst_47 = arith.constant dense<0.000000e+00> : vector<256xf32>
    %77 = vector.multi_reduction <add>, %76, %cst_47 [0] : vector<64x256xf32> to vector<256xf32>
    %78 = vector.shape_cast %77 : vector<256xf32> to vector<1x256xf32>
    %c0_48 = arith.constant 0 : index
    %c0_49 = arith.constant 0 : index
    %79 = vector.load %arg11[%c0_48, %c0_49] : memref<256x8xf32, #tpu.memory_space<vmem>>, vector<256x8xf32>
    %cst_50 = arith.constant dense<0.000000e+00> : vector<1x8xf32>
    %80 = tpu.matmul %78, %79, %cst_50 {dimension_numbers = #tpu.dot_dimension_numbers<[1], [0], [0], [1], [0, 0, 1, 1], [], []>} : vector<1x256xf32>, vector<256x8xf32>, vector<1x8xf32> -> vector<1x8xf32>
    %cst_51 = arith.constant 4.8828125E-4 : f32
    %81 = vector.broadcast %cst_51 : f32 to vector<1x8xf32>
    %82 = arith.mulf %80, %81 : vector<1x8xf32>
    %cst_52 = arith.constant 9.99999974E-6 : f32
    %83 = vector.broadcast %cst_52 : f32 to vector<1x8xf32>
    %84 = arith.addf %82, %83 : vector<1x8xf32>
    %85 = math.rsqrt %84 : vector<1x8xf32>
    %c0_53 = arith.constant 0 : index
    %c0_54 = arith.constant 0 : index
    %86 = vector.load %arg12[%c0_53, %c0_54] : memref<8x256xf32, #tpu.memory_space<vmem>>, vector<8x256xf32>
    %cst_55 = arith.constant dense<0.000000e+00> : vector<1x256xf32>
    %87 = tpu.matmul %85, %86, %cst_55 {dimension_numbers = #tpu.dot_dimension_numbers<[1], [0], [0], [1], [0, 0, 1, 1], [], []>} : vector<1x8xf32>, vector<8x256xf32>, vector<1x256xf32> -> vector<1x256xf32>
    %88 = vector.broadcast %87 : vector<1x256xf32> to vector<64x256xf32>
    %89 = arith.mulf %75, %88 : vector<64x256xf32>
    %90 = vector.broadcast %64 : vector<1x256xf32> to vector<64x256xf32>
    %91 = arith.mulf %89, %90 : vector<64x256xf32>
    %92 = vector.broadcast %65 : vector<1x256xf32> to vector<64x256xf32>
    %93 = arith.addf %91, %92 : vector<64x256xf32>
    %cst_56 = arith.constant 0.000000e+00 : f32
    %94 = vector.broadcast %cst_56 : f32 to vector<64x256xf32>
    %95 = arith.maximumf %93, %94 : vector<64x256xf32>
    %cst_57 = arith.constant 0.000000e+00 : f32
    %96 = vector.broadcast %cst_57 : f32 to vector<1x256xf32>
    %c0_58 = arith.constant 0 : index
    %c0_59 = arith.constant 0 : index
    %97 = vector.load %arg16[%c0_58, %c0_59] : memref<66x256xf32, #tpu.memory_space<vmem>>, vector<1x256xf32>
    tpu.vector_store %arg16[%c0_58, %c0_59], %96 {strides = array<i32>} : memref<66x256xf32, #tpu.memory_space<vmem>>, vector<1x256xf32>,
    %cst_60 = arith.constant 0.000000e+00 : f32
    %98 = vector.broadcast %cst_60 : f32 to vector<1x256xf32>
    %c65_61 = arith.constant 65 : index
    %c0_62 = arith.constant 0 : index
    %99 = vector.load %arg16[%c65_61, %c0_62] : memref<66x256xf32, #tpu.memory_space<vmem>>, vector<1x256xf32>
    tpu.vector_store %arg16[%c65_61, %c0_62], %98 {strides = array<i32>} : memref<66x256xf32, #tpu.memory_space<vmem>>, vector<1x256xf32>,
    %c1_63 = arith.constant 1 : index
    %c0_64 = arith.constant 0 : index
    %100 = vector.load %arg16[%c1_63, %c0_64] : memref<66x256xf32, #tpu.memory_space<vmem>>, vector<64x256xf32>
    tpu.vector_store %arg16[%c1_63, %c0_64], %95 {strides = array<i32>} : memref<66x256xf32, #tpu.memory_space<vmem>>, vector<64x256xf32>,
    %c0_65 = arith.constant 0 : index
    %c0_66 = arith.constant 0 : index
    %101 = vector.load %arg16[%c0_65, %c0_66] : memref<66x256xf32, #tpu.memory_space<vmem>>, vector<64x256xf32>
    %c-1_i32_67 = arith.constant -1 : i32
    %102 = vector.broadcast %c-1_i32_67 : i32 to vector<64x1xi32>
    %103 = arith.addi %16, %102 : vector<64x1xi32>
    %c0_i32_68 = arith.constant 0 : i32
    %104 = vector.broadcast %c0_i32_68 : i32 to vector<64x1xi32>
    %105 = arith.cmpi sge, %103, %104 : vector<64x1xi32>
    %c-1_i32_69 = arith.constant -1 : i32
    %106 = vector.broadcast %c-1_i32_69 : i32 to vector<64x1xi32>
    %107 = arith.addi %16, %106 : vector<64x1xi32>
    %c32_i32_70 = arith.constant 32 : i32
    %108 = vector.broadcast %c32_i32_70 : i32 to vector<64x1xi32>
    %109 = arith.cmpi slt, %107, %108 : vector<64x1xi32>
    %110 = arith.andi %105, %109 : vector<64x1xi1>
    %111 = arith.extui %110 : vector<64x1xi1> to vector<64x1xi32>
    %112 = arith.sitofp %111 : vector<64x1xi32> to vector<64x1xf32>
    %113 = vector.broadcast %112 : vector<64x1xf32> to vector<64x256xf32>
    %114 = arith.mulf %101, %113 : vector<64x256xf32>
    %c0_71 = arith.constant 0 : index
    %c0_72 = arith.constant 0 : index
    %115 = vector.load %arg17[%c0_71, %c0_72] : memref<64x768xf32, #tpu.memory_space<vmem>>, vector<64x256xf32>
    tpu.vector_store %arg17[%c0_71, %c0_72], %114 {strides = array<i32>} : memref<64x768xf32, #tpu.memory_space<vmem>>, vector<64x256xf32>,
    %c1_73 = arith.constant 1 : index
    %c0_74 = arith.constant 0 : index
    %116 = vector.load %arg16[%c1_73, %c0_74] : memref<66x256xf32, #tpu.memory_space<vmem>>, vector<64x256xf32>
    %c0_75 = arith.constant 0 : index
    %c256 = arith.constant 256 : index
    %117 = vector.load %arg17[%c0_75, %c256] : memref<64x768xf32, #tpu.memory_space<vmem>>, vector<64x256xf32>
    tpu.vector_store %arg17[%c0_75, %c256], %116 {strides = array<i32>} : memref<64x768xf32, #tpu.memory_space<vmem>>, vector<64x256xf32>,
    %c2_76 = arith.constant 2 : index
    %c0_77 = arith.constant 0 : index
    %118 = vector.load %arg16[%c2_76, %c0_77] : memref<66x256xf32, #tpu.memory_space<vmem>>, vector<64x256xf32>
    %c1_i32_78 = arith.constant 1 : i32
    %119 = vector.broadcast %c1_i32_78 : i32 to vector<64x1xi32>
    %120 = arith.addi %16, %119 : vector<64x1xi32>
    %c0_i32_79 = arith.constant 0 : i32
    %121 = vector.broadcast %c0_i32_79 : i32 to vector<64x1xi32>
    %122 = arith.cmpi sge, %120, %121 : vector<64x1xi32>
    %c1_i32_80 = arith.constant 1 : i32
    %123 = vector.broadcast %c1_i32_80 : i32 to vector<64x1xi32>
    %124 = arith.addi %16, %123 : vector<64x1xi32>
    %c32_i32_81 = arith.constant 32 : i32
    %125 = vector.broadcast %c32_i32_81 : i32 to vector<64x1xi32>
    %126 = arith.cmpi slt, %124, %125 : vector<64x1xi32>
    %127 = arith.andi %122, %126 : vector<64x1xi1>
    %128 = arith.extui %127 : vector<64x1xi1> to vector<64x1xi32>
    %129 = arith.sitofp %128 : vector<64x1xi32> to vector<64x1xf32>
    %130 = vector.broadcast %129 : vector<64x1xf32> to vector<64x256xf32>
    %131 = arith.mulf %118, %130 : vector<64x256xf32>
    %c0_82 = arith.constant 0 : index
    %c512 = arith.constant 512 : index
    %132 = vector.load %arg17[%c0_82, %c512] : memref<64x768xf32, #tpu.memory_space<vmem>>, vector<64x256xf32>
    tpu.vector_store %arg17[%c0_82, %c512], %131 {strides = array<i32>} : memref<64x768xf32, #tpu.memory_space<vmem>>, vector<64x256xf32>,
    %c0_83 = arith.constant 0 : index
    %c0_84 = arith.constant 0 : index
    %133 = vector.load %arg17[%c0_83, %c0_84] : memref<64x768xf32, #tpu.memory_space<vmem>>, vector<64x768xf32>
    %134 = arith.truncf %133 : vector<64x768xf32> to vector<64x768xbf16>
    %c0_85 = arith.constant 0 : index
    %c0_86 = arith.constant 0 : index
    %135 = vector.load %arg7[%c0_85, %c0_86] : memref<768x256xbf16, #tpu.memory_space<vmem>>, vector<768x256xbf16>
    %cst_87 = arith.constant dense<0.000000e+00> : vector<64x256xf32>
    %136 = tpu.matmul %134, %135, %cst_87 {dimension_numbers = #tpu.dot_dimension_numbers<[1], [0], [0], [1], [0, 0, 1, 1], [], []>} : vector<64x768xbf16>, vector<768x256xbf16>, vector<64x256xf32> -> vector<64x256xf32>
    %c0_88 = arith.constant 0 : index
    %c0_89 = arith.constant 0 : index
    %137 = vector.load %arg8[%c0_88, %c0_89] : memref<1x256xf32, #tpu.memory_space<vmem>>, vector<1x256xf32>
    %138 = vector.broadcast %137 : vector<1x256xf32> to vector<64x256xf32>
    %139 = arith.addf %136, %138 : vector<64x256xf32>
    %c0_90 = arith.constant 0 : index
    %c0_91 = arith.constant 0 : index
    %140 = vector.load %arg9[%c0_90, %c0_91] : memref<1x256xf32, #tpu.memory_space<vmem>>, vector<1x256xf32>
    %c0_92 = arith.constant 0 : index
    %c0_93 = arith.constant 0 : index
    %141 = vector.load %arg10[%c0_92, %c0_93] : memref<1x256xf32, #tpu.memory_space<vmem>>, vector<1x256xf32>
    %cst_94 = arith.constant dense<0.000000e+00> : vector<256xf32>
    %142 = vector.multi_reduction <add>, %139, %cst_94 [0] : vector<64x256xf32> to vector<256xf32>
    %143 = vector.shape_cast %142 : vector<256xf32> to vector<1x256xf32>
    %c0_95 = arith.constant 0 : index
    %c0_96 = arith.constant 0 : index
    %144 = vector.load %arg11[%c0_95, %c0_96] : memref<256x8xf32, #tpu.memory_space<vmem>>, vector<256x8xf32>
    %cst_97 = arith.constant dense<0.000000e+00> : vector<1x8xf32>
    %145 = tpu.matmul %143, %144, %cst_97 {dimension_numbers = #tpu.dot_dimension_numbers<[1], [0], [0], [1], [0, 0, 1, 1], [], []>} : vector<1x256xf32>, vector<256x8xf32>, vector<1x8xf32> -> vector<1x8xf32>
    %cst_98 = arith.constant 4.8828125E-4 : f32
    %146 = vector.broadcast %cst_98 : f32 to vector<1x8xf32>
    %147 = arith.mulf %145, %146 : vector<1x8xf32>
    %c0_99 = arith.constant 0 : index
    %c0_100 = arith.constant 0 : index
    %148 = vector.load %arg12[%c0_99, %c0_100] : memref<8x256xf32, #tpu.memory_space<vmem>>, vector<8x256xf32>
    %cst_101 = arith.constant dense<0.000000e+00> : vector<1x256xf32>
    %149 = tpu.matmul %147, %148, %cst_101 {dimension_numbers = #tpu.dot_dimension_numbers<[1], [0], [0], [1], [0, 0, 1, 1], [], []>} : vector<1x8xf32>, vector<8x256xf32>, vector<1x256xf32> -> vector<1x256xf32>
    %150 = vector.broadcast %149 : vector<1x256xf32> to vector<64x256xf32>
    %151 = arith.subf %139, %150 : vector<64x256xf32>
    %152 = arith.mulf %151, %151 : vector<64x256xf32>
    %cst_102 = arith.constant dense<0.000000e+00> : vector<256xf32>
    %153 = vector.multi_reduction <add>, %152, %cst_102 [0] : vector<64x256xf32> to vector<256xf32>
    %154 = vector.shape_cast %153 : vector<256xf32> to vector<1x256xf32>
    %c0_103 = arith.constant 0 : index
    %c0_104 = arith.constant 0 : index
    %155 = vector.load %arg11[%c0_103, %c0_104] : memref<256x8xf32, #tpu.memory_space<vmem>>, vector<256x8xf32>
    %cst_105 = arith.constant dense<0.000000e+00> : vector<1x8xf32>
    %156 = tpu.matmul %154, %155, %cst_105 {dimension_numbers = #tpu.dot_dimension_numbers<[1], [0], [0], [1], [0, 0, 1, 1], [], []>} : vector<1x256xf32>, vector<256x8xf32>, vector<1x8xf32> -> vector<1x8xf32>
    %cst_106 = arith.constant 4.8828125E-4 : f32
    %157 = vector.broadcast %cst_106 : f32 to vector<1x8xf32>
    %158 = arith.mulf %156, %157 : vector<1x8xf32>
    %cst_107 = arith.constant 9.99999974E-6 : f32
    %159 = vector.broadcast %cst_107 : f32 to vector<1x8xf32>
    %160 = arith.addf %158, %159 : vector<1x8xf32>
    %161 = math.rsqrt %160 : vector<1x8xf32>
    %c0_108 = arith.constant 0 : index
    %c0_109 = arith.constant 0 : index
    %162 = vector.load %arg12[%c0_108, %c0_109] : memref<8x256xf32, #tpu.memory_space<vmem>>, vector<8x256xf32>
    %cst_110 = arith.constant dense<0.000000e+00> : vector<1x256xf32>
    %163 = tpu.matmul %161, %162, %cst_110 {dimension_numbers = #tpu.dot_dimension_numbers<[1], [0], [0], [1], [0, 0, 1, 1], [], []>} : vector<1x8xf32>, vector<8x256xf32>, vector<1x256xf32> -> vector<1x256xf32>
    %164 = vector.broadcast %163 : vector<1x256xf32> to vector<64x256xf32>
    %165 = arith.mulf %151, %164 : vector<64x256xf32>
    %166 = vector.broadcast %140 : vector<1x256xf32> to vector<64x256xf32>
    %167 = arith.mulf %165, %166 : vector<64x256xf32>
    %168 = vector.broadcast %141 : vector<1x256xf32> to vector<64x256xf32>
    %169 = arith.addf %167, %168 : vector<64x256xf32>
    %cst_111 = arith.constant 0.000000e+00 : f32
    %170 = vector.broadcast %cst_111 : f32 to vector<64x256xf32>
    %171 = arith.maximumf %169, %170 : vector<64x256xf32>
    %c0_112 = arith.constant 0 : index
    %c0_113 = arith.constant 0 : index
    %172 = vector.load %arg13[%c0_112, %c0_113] : memref<64x256xf32, #tpu.memory_space<vmem>>, vector<64x256xf32>
    tpu.vector_store %arg13[%c0_112, %c0_113], %171 {strides = array<i32>} : memref<64x256xf32, #tpu.memory_space<vmem>>, vector<64x256xf32>,
    return
  }
  func.func @transform_0(%arg0: i32) -> (i32, i32) {
    %c0_i32 = arith.constant 0 : i32
    %c0_i32_0 = arith.constant 0 : i32
    %c0_i32_1 = arith.constant 0 : i32
    return %c0_i32, %c0_i32_0 : i32, i32
  }
  func.func @transform_1(%arg0: i32) -> (i32, i32) {
    %c0_i32 = arith.constant 0 : i32
    %c0_i32_0 = arith.constant 0 : i32
    %c0_i32_1 = arith.constant 0 : i32
    return %c0_i32, %c0_i32_0 : i32, i32
  }
  func.func @transform_2(%arg0: i32) -> (i32, i32) {
    %c0_i32 = arith.constant 0 : i32
    %c0_i32_0 = arith.constant 0 : i32
    %c0_i32_1 = arith.constant 0 : i32
    return %c0_i32, %c0_i32_0 : i32, i32
  }
  func.func @transform_3(%arg0: i32) -> (i32, i32) {
    %c0_i32 = arith.constant 0 : i32
    %c0_i32_0 = arith.constant 0 : i32
    %c0_i32_1 = arith.constant 0 : i32
    return %c0_i32, %c0_i32_0 : i32, i32
  }
  func.func @transform_4(%arg0: i32) -> (i32, i32) {
    %c0_i32 = arith.constant 0 : i32
    %c0_i32_0 = arith.constant 0 : i32
    %c0_i32_1 = arith.constant 0 : i32
    return %c0_i32, %c0_i32_0 : i32, i32
  }
  func.func @transform_5(%arg0: i32) -> (i32, i32) {
    %c0_i32 = arith.constant 0 : i32
    %c0_i32_0 = arith.constant 0 : i32
    %c0_i32_1 = arith.constant 0 : i32
    return %c0_i32, %c0_i32_0 : i32, i32
  }
  func.func @transform_6(%arg0: i32) -> (i32, i32) {
    %c0_i32 = arith.constant 0 : i32
    %c0_i32_0 = arith.constant 0 : i32
    %c0_i32_1 = arith.constant 0 : i32
    return %c0_i32, %c0_i32_0 : i32, i32
  }
  func.func @transform_7(%arg0: i32) -> (i32, i32) {
    %c0_i32 = arith.constant 0 : i32
    %c0_i32_0 = arith.constant 0 : i32
    %c0_i32_1 = arith.constant 0 : i32
    return %c0_i32, %c0_i32_0 : i32, i32
  }
  func.func @transform_8(%arg0: i32) -> (i32, i32) {
    %c0_i32 = arith.constant 0 : i32
    %c0_i32_0 = arith.constant 0 : i32
    %c0_i32_1 = arith.constant 0 : i32
    return %c0_i32, %c0_i32_0 : i32, i32
  }
  func.func @transform_9(%arg0: i32) -> (i32, i32) {
    %c0_i32 = arith.constant 0 : i32
    %c0_i32_0 = arith.constant 0 : i32
    %c0_i32_1 = arith.constant 0 : i32
    return %c0_i32, %c0_i32_0 : i32, i32
  }
  func.func @transform_10(%arg0: i32) -> (i32, i32) {
    %c0_i32 = arith.constant 0 : i32
    %c0_i32_0 = arith.constant 0 : i32
    %c0_i32_1 = arith.constant 0 : i32
    return %c0_i32, %c0_i32_0 : i32, i32
  }
  func.func @transform_11(%arg0: i32) -> (i32, i32) {
    %c0_i32 = arith.constant 0 : i32
    %c0_i32_0 = arith.constant 0 : i32
    %c0_i32_1 = arith.constant 0 : i32
    return %c0_i32, %c0_i32_0 : i32, i32
  }
  func.func @transform_12(%arg0: i32) -> (i32, i32) {
    %c0_i32 = arith.constant 0 : i32
    %c0_i32_0 = arith.constant 0 : i32
    %c0_i32_1 = arith.constant 0 : i32
    return %c0_i32, %c0_i32_0 : i32, i32
  }
}

</mosaic_0001>

<bundles_post_ra>
// kernel: up_block_forward.1
= control target key start
LH: loop header
LB: loop body
LE: loop exit
PB: predicated region body
PF: predicated region fallthrough
CT: control target
= control target key end

     0   :  { %17 = vsyncpa [#allocation7], 0  ;;  %s5217_s0 = inlined_call_operand.vmem [shape: bf16[32,64], index: 0, kind: input, shape index: {}]   ;;  %s5218_s1 = inlined_call_operand.vmem [shape: bf16[64,32], index: 1, kind: input, shape index: {}]   ;;  %s5219_s2 = inlined_call_operand.hbm [shape: bf16[192,256], index: 2, kind: input, shape index: {}]   ;;  %s5220_s3 = inlined_call_operand.vmem [shape: f32[1,256], index: 3, kind: input, shape index: {}]   ;;  %s5221_s4 = inlined_call_operand.vmem [shape: f32[1,256], index: 4, kind: input, shape index: {}]   ;;  %s5222_s5 = inlined_call_operand.hbm [shape: f32[1,256], index: 5, kind: input, shape index: {}]   ;;  %s5223_s6 = inlined_call_operand.vmem [shape: bf16[768,256], index: 6, kind: input, shape index: {}]   ;;  %s5224_s7 = inlined_call_operand.hbm [shape: f32[1,256], index: 7, kind: input, shape index: {}]   ;;  %s5225_s8 = inlined_call_operand.hbm [shape: f32[1,256], index: 8, kind: input, shape index: {}]   ;;  %s5226_s9 = inlined_call_operand.hbm [shape: f32[1,256], index: 9, kind: input, shape index: {}]   ;;  %s5227_s10 = inlined_call_operand.vmem [shape: f32[256,8], index: 10, kind: input, shape index: {}]   ;;  %s5228_s11 = inlined_call_operand.hbm [shape: f32[8,256], index: 11, kind: input, shape index: {}]   ;;  %s5229_s12 = inlined_call_operand.vmem [shape: f32[64,256], index: 12, kind: output, shape index: {}]  }
   0x1   :  { %18 = vsyncpa [#allocation9], 0 }
   0x2   :  { %19 = vsyncpa [#allocation12], 0 }
   0x3   :  { %20 = vsyncpa [#allocation15], 0  ;;  %s3769_s21 = smov [#allocation8]   ;;  %s3770_s23 = smov [#allocation11]  }
   0x4   :  { %s47_s22 = sshll.u32 %s3769_s21, 4  ;;  %s69_s24 = sshll.u32 %s3770_s23, 4  ;;  %s48_s22 = int_to_ptr.vmem [resolvable:$true] %s47_s22  ;;  %s70_s24 = int_to_ptr.vmem [resolvable:$true] %s69_s24 }
   0x5   :  { %s3649_s25 = scalar_lea.vmem %s48_s22, 32  ;;  %p3654_p1 = scmp.lt.s32.totalorder %s48_s22, %s48_s22 }
   0x6   :  { %p3650_p0 = scmp.ne.s32.totalorder %s48_s22, %s3649_s25  ;;  %p3655_p2 = scmp.lt.s32.totalorder %s3649_s25, %s3649_s25 }
   0x8   :  { %p3656_p3 = por %p3655_p2, %p3654_p1 }
   0xa   :  { %p3657_p4 = pnand %p3656_p3, %p3650_p0 }
   0xc   :  { %3660 = shalt.err (!%p3657_p4)
}
   0xd   :  { %50 = dma.hbm_to_vmem [thread:$0]  %s5222_s5, 32, %s48_s22, [#allocation9]  }
   0xe   :  { %s3669_s28 = scalar_lea.vmem %s70_s24, 32  ;;  %p3674_p6 = scmp.lt.s32.totalorder %s70_s24, %s70_s24 }
   0xf   :  { %p3670_p5 = scmp.ne.s32.totalorder %s70_s24, %s3669_s28  ;;  %p3675_p7 = scmp.lt.s32.totalorder %s3669_s28, %s3669_s28 }
  0x11   :  { %p3676_p8 = por %p3675_p7, %p3674_p6 }
  0x13   :  { %p3677_p9 = pnand %p3676_p8, %p3670_p5 }
  0x15   :  { %3680 = shalt.err (!%p3677_p9)
}
  0x16   :  { %72 = dma.hbm_to_vmem [thread:$0]  %s5225_s8, 32, %s70_s24, [#allocation12]  }
  0x17   :  { %s3771_s13 = smov [#allocation6]  }
  0x18   :  { %s30_s14 = sshll.u32 %s3771_s13, 4  ;;  %s31_s14 = int_to_ptr.vmem [resolvable:$true] %s30_s14 }
  0x19   :  { %s3689_s15 = scalar_lea.vmem %s31_s14, 3072  ;;  %p3694_p11 = scmp.lt.s32.totalorder %s31_s14, %s31_s14 }
  0x1a   :  { %p3690_p10 = scmp.ne.s32.totalorder %s31_s14, %s3689_s15  ;;  %p3695_p12 = scmp.lt.s32.totalorder %s3689_s15, %s3689_s15 }
  0x1c   :  { %p3696_p13 = por %p3695_p12, %p3694_p11 }
  0x1e   :  { %p3697_p0 = pnand %p3696_p13, %p3690_p10 }
  0x20   :  { %3700 = shalt.err (!%p3697_p0)
}
  0x21   :  { %s3772_s5 = smov 128   ;;  %s3773_s16 = smov 8  }
  0x22   :  { %36 = dma.hbm_to_vmem [thread:$0]  %s5219_s2, 3072, %s31_s14, [#allocation7], %s3772_s5, %s3772_s5, %s3773_s16  }
  0x23   :  { %s3774_s19 = smov [#allocation10]   ;;  %s3775_s8 = smov [#allocation13]  }
  0x24   :  { %s59_s20 = sshll.u32 %s3774_s19, 4  ;;  %s79_s21 = sshll.u32 %s3775_s8, 4  ;;  %s60_s20 = int_to_ptr.vmem [resolvable:$true] %s59_s20  ;;  %s80_s21 = int_to_ptr.vmem [resolvable:$true] %s79_s21 }
  0x25   :  { %s3709_s22 = scalar_lea.vmem %s60_s20, 32  ;;  %p3714_p2 = scmp.lt.s32.totalorder %s60_s20, %s60_s20 }
  0x26   :  { %p3710_p1 = scmp.ne.s32.totalorder %s60_s20, %s3709_s22  ;;  %p3715_p3 = scmp.lt.s32.totalorder %s3709_s22, %s3709_s22 }
  0x28   :  { %p3716_p4 = por %p3715_p3, %p3714_p2 }
  0x2a   :  { %p3717_p5 = pnand %p3716_p4, %p3710_p1 }
  0x2c   :  { %3720 = shalt.err (!%p3717_p5)
}
  0x2d   :  { %62 = dma.hbm_to_vmem [thread:$0]  %s5224_s7, 32, %s60_s20, [#allocation9]  }
  0x2e   :  { %s3729_s25 = scalar_lea.vmem %s80_s21, 32  ;;  %p3734_p7 = scmp.lt.s32.totalorder %s80_s21, %s80_s21 }
  0x2f   :  { %p3730_p6 = scmp.ne.s32.totalorder %s80_s21, %s3729_s25  ;;  %p3735_p8 = scmp.lt.s32.totalorder %s3729_s25, %s3729_s25 }
  0x31   :  { %p3736_p9 = por %p3735_p8, %p3734_p7 }
  0x33   :  { %p3737_p10 = pnand %p3736_p9, %p3730_p6 }
  0x35   :  { %3740 = shalt.err (!%p3737_p10)
}
  0x36   :  { %82 = dma.hbm_to_vmem [thread:$0]  %s5226_s9, 32, %s80_s21, [#allocation12]  }
  0x37   :  { %s3776_s27 = smov [#allocation14]  }
  0x38   :  { %s91_s28 = sshll.u32 %s3776_s27, 4  ;;  %s92_s28 = int_to_ptr.vmem [resolvable:$true] %s91_s28 }
  0x39   :  { %s3749_s29 = scalar_lea.vmem %s92_s28, 256  ;;  %p3754_p12 = scmp.lt.s32.totalorder %s92_s28, %s92_s28 }
  0x3a   :  { %p3750_p11 = scmp.ne.s32.totalorder %s92_s28, %s3749_s29  ;;  %p3755_p13 = scmp.lt.s32.totalorder %s3749_s29, %s3749_s29 }
  0x3c   :  { %p3756_p0 = por %p3755_p13, %p3754_p12 }
  0x3e   :  { %p3757_p1 = pnand %p3756_p0, %p3750_p11 }
  0x40   :  { %3760 = shalt.err (!%p3757_p1)
}
  0x41   :  { %94 = dma.hbm_to_vmem [thread:$0]  %s5228_s11, 256, %s92_s28, [#allocation15]  }
  0x42   :  { %3761 = dma.done.wait [#allocation7], 3072  }
  0x43   :  { %3762 = vsyncadd [#allocation7], 4294964224 }
  0x44   :  { %3763 = dma.done.wait [#allocation9], 64  }
  0x45   :  { %3764 = vsyncadd [#allocation9], 4294967232 }
  0x46   :  { %3765 = dma.done.wait [#allocation12], 64  }
  0x47   :  { %3766 = vsyncadd [#allocation12], 4294967232 }
  0x48   :  { %3767 = dma.done.wait [#allocation15], 256  }
  0x49   :  { %3768 = vsyncadd [#allocation15], 4294967040  ;;  %v3451_v0 = vld [vmem:[%s5217_s0 + $0x8] sm:$0xff]   ;;  %v3452_v1 = vld [vmem:[%s5217_s0] sm:$0xff]   ;;  %vm263_vm0 = vcmask 261120   ;;  %vm341_vm1 = vcmask 516096   ;;  %v114_v23 = vlaneseq }
  0x4a   :  { %3428 = vmatprep.subr.bf16.mxu0 %v3451_v0  ;;  %v3453_v2 = vld [vmem:[%s5218_s1] sm:$0xff]   ;;  %v3454_v3 = vld [vmem:[%s5218_s1 + $0x8] sm:$0xff]   ;;  %v3455_v4 = vld [vmem:[%s5218_s1 + $0x10] sm:$0xff]   ;;  %v5230_v6 = vmov 0.0   ;;  %vm344_vm3 = vcmask 523264   ;;  %vm465_vm8 = vcmask 1048064  }
  0x4b   :  { %3429 = vmatpush3.bf16.msra.mxu0 %v3451_v0  ;;  %3432 = vmatprep.mubr.msk.bf16.mxu0 %vm263_vm0, %v3453_v2  ;;  %v3456_v5 = vld [vmem:[%s5218_s1 + $0x18] sm:$0xff]   ;;  %343 = vst.msk [vmem:[#allocation2 + $0x41] sm:$0x1] %vm341_vm1, %v5230_v6  ;;  %342 = vst.msk [vmem:[#allocation2] sm:$0x1] %vm341_vm1, %v5230_v6  ;;  %v3883_v24 = vshrl.u32 %v114_v23, 7 }
  0x4c   :  { %3430 = vmatprep.subr.bf16.mxu0 %v3452_v1  ;;  %v3457_v7 = vld [vmem:[#allocation6 + $0x74] ss:$8 sps:$4 sm:$0xff]   ;;  %v3459_v8 = vld [vmem:[#allocation6 + $0x70] ss:$8 sps:$4 sm:$0xff]   ;;  %v3460_v9 = vld [vmem:[#allocation6 + $0x64] ss:$8 sps:$4 sm:$0xff]  }
  0x4d   :  { %738 = vmatprep.subr.bf16.mxu1 %v3457_v7  ;;  %v3462_v10 = vld [vmem:[#allocation6 + $0x60] ss:$8 sps:$4 sm:$0xff]   ;;  %v3463_v11 = vld [vmem:[#allocation6 + $0x54] ss:$8 sps:$4 sm:$0xff]   ;;  %v3465_v12 = vld [vmem:[#allocation6 + $0x50] ss:$8 sps:$4 sm:$0xff]  }
  0x4e   :  { %739 = vmatpush1.bf16.msra.mxu1 %v3459_v8  ;;  %v3466_v13 = vld [vmem:[#allocation6 + $0x44] ss:$8 sps:$4 sm:$0xff]   ;;  %v3468_v14 = vld [vmem:[#allocation6 + $0x40] ss:$8 sps:$4 sm:$0xff]   ;;  %v3469_v15 = vld [vmem:[#allocation6 + $0x34] ss:$8 sps:$4 sm:$0xff]  }
  0x4f   :  { %3431 = vmatpush3.bf16.msra.mxu0 %v3452_v1  ;;  %740 = vmatprep.subr.bf16.mxu1 %v3460_v9  ;;  %v3471_v16 = vld [vmem:[#allocation6 + $0x30] ss:$8 sps:$4 sm:$0xff]   ;;  %v3472_v17 = vld [vmem:[#allocation6 + $0x24] ss:$8 sps:$4 sm:$0xff]   ;;  %v3474_v18 = vld [vmem:[#allocation6 + $0x20] ss:$8 sps:$4 sm:$0xff]  }
  0x50   :  { %v3475_v19 = vld [vmem:[#allocation6 + $0x14] ss:$8 sps:$4 sm:$0xff]   ;;  %v3477_v20 = vld [vmem:[#allocation6 + $0x10] ss:$8 sps:$4 sm:$0xff]   ;;  %v3478_v21 = vld [vmem:[#allocation6 + $0x4] ss:$8 sps:$4 sm:$0xff]  }
  0x51   :  { %v3480_v22 = vld [vmem:[#allocation6] ss:$8 sps:$4 sm:$0xff]   ;;  %v3481_v25 = vld [vmem:[#allocation6 + $0xb4] ss:$8 sps:$4 sm:$0xff]   ;;  %v3483_v26 = vld [vmem:[#allocation6 + $0xb0] ss:$8 sps:$4 sm:$0xff]  }
  0x52   :  { %3433 = vmatmul.mubr.msk.bf16.vlgmr.msra.gmra.mxu0 %vm263_vm0, %v3454_v3  ;;  %741 = vmatpush1.bf16.msra.mxu1 %v3462_v10  ;;  %vm1328_vm2 = vcmp.lt.s32.totalorder %v114_v23, 256  ;;  %v127_v27 = vand.u32 31, %v3883_v24  ;;  %v3484_v28 = vld [vmem:[#allocation6 + $0xa4] ss:$8 sps:$4 sm:$0xff]   ;;  %v3486_v30 = vld [vmem:[#allocation6 + $0xa0] ss:$8 sps:$4 sm:$0xff]  }
  0x53   :  { %3436 = vmatprep.mubr.msk.bf16.mxu0 %vm263_vm0, %v3455_v4  ;;  %742 = vmatprep.subr.bf16.mxu1 %v3463_v11  ;;  %1333 = vst.msk [vmem:[#allocation4 + $0x81] ss:$8 sm:$0x3] %vm1328_vm2, %v5230_v6  ;;  %1330 = vst.msk [vmem:[#allocation4] ss:$8 sm:$0x3] %vm1328_vm2, %v5230_v6 }
  0x54   :  { %v361_v31 = vadd.s32 4294967295, %v127_v27  ;;  %v119_v32 = vadd.s32 32, %v3883_v24  ;;  %v118_v33 = vadd.s32 24, %v3883_v24  ;;  %v3487_v35 = vld [vmem:[#allocation6 + $0x94] ss:$8 sps:$4 sm:$0xff]   ;;  %v122_v37 = vadd.s32 56, %v3883_v24 }
  0x55   :  { %v3489_v36 = vld [vmem:[#allocation6 + $0x90] ss:$8 sps:$4 sm:$0xff]   ;;  %v3490_v42 = vld [vmem:[#allocation6 + $0x84] ss:$8 sps:$4 sm:$0xff]   ;;  %v3492_v43 = vld [vmem:[#allocation6 + $0x80] ss:$8 sps:$4 sm:$0xff]  }
  0x56   :  { %743 = vmatpush1.bf16.msra.mxu1 %v3465_v12  ;;  %vm369_vm4 = vcmp.ge.s32.totalorder %v361_v31, 0  ;;  %v155_v39 = vand.u32 31, %v119_v32  ;;  %v148_v40 = vand.u32 31, %v118_v33  ;;  %v176_v44 = vand.u32 31, %v122_v37  ;;  %s3778_s1 = smov 64  }
  0x57   :  { %744 = vmatprep.subr.bf16.mxu1 %v3466_v13  ;;  %v3896_v47 = vsel %vm369_vm4, 1.0, %v5230_v6  ;;  %vm944_vm9 = vcmask 64512   ;;  %vm1351_vm10 = vcmask 1040384   ;;  %vm1595_vm11 = vcmask 1041408  }
  0x58   :  { %5244 = vst [vmem:[#allocation20_spill] sm:$0xff] %v3896_v47  ;;  %v365_v48 = vadd.s32 4294967295, %v155_v39  ;;  %v485_v49 = vadd.s32 1, %v148_v40  ;;  %v489_v54 = vadd.s32 1, %v176_v44  ;;  %vm1502_vm12 = vcmask 1046528  }
  0x59   :  { %vm1656_vm13 = vcmask 1045504  }
  0x5a   :  { %3437 = vmatmul.mubr.msk.bf16.gmra.mxu0 %vm263_vm0, %v3456_v5  ;;  %745 = vmatpush1.bf16.msra.mxu1 %v3468_v14  ;;  %vm373_vm5 = vcmp.ge.s32.totalorder %v365_v48, 0  ;;  %vm501_vm6 = vcmp.lt.s32.totalorder %v485_v49, 32  ;;  %vm505_vm7 = vcmp.lt.s32.totalorder %v489_v54, 32 }
  0x5b   :  { %746 = vmatprep.subr.bf16.mxu1 %v3469_v15  ;;  %v3915_v1 = vsel %vm373_vm5, 1.0, %v5230_v6  ;;  %v3918_v2 = vsel %vm501_vm6, 1.0, %v5230_v6  ;;  %v3921_v7 = vsel %vm505_vm7, 1.0, %v5230_v6 }
  0x5c   :  { %5245 = vst [vmem:[#allocation21_spill] sm:$0xff] %v3915_v1  ;;  %5246 = vst [vmem:[#allocation22_spill] sm:$0xff] %v3918_v2 }
  0x5d   :  { %5247 = vst [vmem:[#allocation23_spill] sm:$0xff] %v3921_v7 }
  0x5e   :  { %747 = vmatpush1.bf16.msra.mxu1 %v3471_v16 }
  0x5f   :  { %748 = vmatprep.subr.bf16.mxu1 %v3472_v17 }
  0x62   :  { %749 = vmatpush1.bf16.msra.mxu1 %v3474_v18 }
  0x63   :  { %750 = vmatprep.subr.bf16.mxu1 %v3475_v19 }
  0x66   :  { %751 = vmatpush1.bf16.msra.mxu1 %v3477_v20 }
  0x67   :  { %752 = vmatprep.subr.bf16.mxu1 %v3478_v21 }
  0x6a   :  { %753 = vmatpush1.bf16.msra.mxu1 %v3480_v22 }
  0x6b   :  { %762 = vmatprep.subr.bf16.mxu1 %v3481_v25 }
  0x6e   :  { %763 = vmatpush2.bf16.msra.mxu1 %v3483_v26 }
  0x6f   :  { %764 = vmatprep.subr.bf16.mxu1 %v3484_v28 }
  0x72   :  { %765 = vmatpush2.bf16.msra.mxu1 %v3486_v30 }
  0x73   :  { %766 = vmatprep.subr.bf16.mxu1 %v3487_v35 }
  0x76   :  { %767 = vmatpush2.bf16.msra.mxu1 %v3489_v36 }
  0x77   :  { %768 = vmatprep.subr.bf16.mxu1 %v3490_v42 }
  0x7a   :  { %769 = vmatpush2.bf16.msra.mxu1 %v3492_v43 }
 0x112   :  { %v3434_v29 = vpop.f32.mrf.mxu0 }
 0x113   :  { %347 = vst.msk [vmem:[#allocation2 + $0x11] sm:$0xff] %vm344_vm3, %v3434_v29 }
 0x114   :  { %v310_v34 = vpop.f32.mrf.mxu0 }
 0x115   :  { %345 = vst.msk [vmem:[#allocation2 + $0x1] sm:$0xff] %vm344_vm3, %v310_v34 }
 0x116   :  { %v3435_v38 = vpop.f32.mrf.mxu0 }
 0x117   :  { %348 = vst.msk [vmem:[#allocation2 + $0x19] sm:$0xff] %vm344_vm3, %v3435_v38 }
 0x118   :  { %v313_v41 = vpop.f32.mrf.mxu0 }
 0x119   :  { %346 = vst.msk [vmem:[#allocation2 + $0x9] sm:$0xff] %vm344_vm3, %v313_v41 }
 0x11a   :  { %v3438_v45 = vpop.f32.mrf.mxu0  ;;  %v427_v46 = vld [vmem:[#allocation2 + $0x11] sm:$0xff] }
 0x11b   :  { %351 = vst.msk [vmem:[#allocation2 + $0x31] sm:$0xff] %vm344_vm3, %v3438_v45  ;;  %445 = vrot.lane.b32.xlu1 %v427_v46, %s3778_s1 }
 0x11c   :  { %v326_v50 = vpop.f32.mrf.mxu0  ;;  %v425_v51 = vld [vmem:[#allocation2 + $0x1] sm:$0xff] }
 0x11d   :  { %v353_v52 = vld [vmem:[#allocation2] sm:$0xff]  ;;  %349 = vst.msk [vmem:[#allocation2 + $0x21] sm:$0xff] %vm344_vm3, %v326_v50  ;;  %441 = vrot.lane.b32.xlu0 %v425_v51, %s3778_s1 }
 0x11e   :  { %v409_v53 = vmul.f32 %v3896_v47, %v353_v52  ;;  %v476_v55 = vld [vmem:[#allocation2 + $0x12] sm:$0xff]  ;;  %v3439_v56 = vpop.f32.mrf.mxu0 }
 0x11f   :  { %v428_v57 = vld [vmem:[#allocation2 + $0x19] sm:$0xff]  ;;  %540 = vst.msk [vmem:[#allocation3 + $0x28] sm:$0xff] %vm344_vm3, %v476_v55  ;;  %352 = vst.msk [vmem:[#allocation2 + $0x39] sm:$0xff] %vm344_vm3, %v3439_v56 }
 0x120   :  { %v356_v58 = vld [vmem:[#allocation2 + $0x18] sm:$0xff]  ;;  %447 = vrot.lane.b32.xlu1 %v428_v57, %s3778_s1  ;;  %417 = vst.msk [vmem:[#allocation3] sm:$0xff] %vm344_vm3, %v409_v53  ;;  %v474_v59 = vld [vmem:[#allocation2 + $0x2] sm:$0xff]  ;;  %v475_v60 = vld [vmem:[#allocation2 + $0xa] sm:$0xff]  ;;  %v329_v61 = vpop.f32.mrf.mxu0 }
 0x121   :  { %420 = vst.msk [vmem:[#allocation3 + $0x30] sm:$0xff] %vm344_vm3, %v356_v58  ;;  %v426_v62 = vld [vmem:[#allocation2 + $0x9] sm:$0xff]  ;;  %538 = vst.msk [vmem:[#allocation3 + $0x8] sm:$0xff] %vm344_vm3, %v474_v59  ;;  %v3954_v55 = vld [vmem:[%s5227_s10 + $0xf8] sm:$0xff] }
 0x122   :  { %539 = vst.msk [vmem:[#allocation3 + $0x18] sm:$0xff] %vm344_vm3, %v475_v60  ;;  %350 = vst.msk [vmem:[#allocation2 + $0x29] sm:$0xff] %vm344_vm3, %v329_v61  ;;  %443 = vrot.lane.b32.xlu0 %v426_v62, %s3778_s1  ;;  %v355_v63 = vld [vmem:[#allocation2 + $0x10] sm:$0xff]  ;;  %v354_v0 = vld [vmem:[#allocation2 + $0x8] sm:$0xff]  ;;  %3288 = vmatprep.subr.mxu0 %v3954_v55 }
 0x123   :  { %419 = vst.msk [vmem:[#allocation3 + $0x20] sm:$0xff] %vm344_vm3, %v355_v63  ;;  %418 = vst.msk [vmem:[#allocation3 + $0x10] sm:$0xff] %vm344_vm3, %v354_v0  ;;  %v431_v12 = vld [vmem:[#allocation2 + $0x31] sm:$0xff]  ;;  %v3978_v59 = vld [vmem:[%s5227_s10 + $0xe8] sm:$0xff] }
 0x124   :  { %v477_v3 = vld [vmem:[#allocation2 + $0x1a] sm:$0xff]  ;;  %v3966_v57 = vld [vmem:[%s5227_s10 + $0xf0] sm:$0xff]  ;;  %v3984_v60 = vld [vmem:[%s5227_s10 + $0x68] sm:$0xff] }
 0x125   :  { %v429_v4 = vld [vmem:[#allocation2 + $0x21] sm:$0xff]  ;;  %v533_v9 = vmul.f32 %v3918_v2, %v477_v3  ;;  %v3960_v56 = vld [vmem:[%s5227_s10 + $0x78] sm:$0xff]  ;;  %v3972_v58 = vld [vmem:[%s5227_s10 + $0x70] sm:$0xff] }
 0x126   :  { %v357_v5 = vld [vmem:[#allocation2 + $0x20] sm:$0xff]  ;;  %449 = vrot.lane.b32.xlu0 %v429_v4, %s3778_s1  ;;  %v480_v10 = vld [vmem:[#allocation2 + $0x32] sm:$0xff]  ;;  %3289 = vmatpush3.msra.mxu0 %v3960_v56 }
 0x127   :  { %v413_v8 = vmul.f32 %v3915_v1, %v357_v5  ;;  %v481_v11 = vld [vmem:[#allocation2 + $0x3a] sm:$0xff]  ;;  %544 = vst.msk [vmem:[#allocation3 + $0x68] sm:$0xff] %vm344_vm3, %v480_v10  ;;  %541 = vst.msk [vmem:[#allocation3 + $0x38] sm:$0xff] %vm344_vm3, %v533_v9  ;;  %v551_v36 = vld [vmem:[#allocation3 + $0x28] sm:$0xff]  ;;  %3290 = vmatprep.subr.mxu0 %v3966_v57 }
 0x128   :  { %v360_v13 = vld [vmem:[#allocation2 + $0x38] sm:$0xff]  ;;  %v537_v14 = vmul.f32 %v3921_v7, %v481_v11  ;;  %v547_v18 = vld [vmem:[#allocation3 + $0x8] sm:$0xff]  ;;  %3291 = vmatpush3.msra.mxu0 %v3972_v58  ;;  %v3990_v61 = vld [vmem:[%s5227_s10 + $0xe0] sm:$0xff] }
 0x129   :  { %421 = vst.msk [vmem:[#allocation3 + $0x40] sm:$0xff] %vm344_vm3, %v413_v8  ;;  %v478_v15 = vld [vmem:[#allocation2 + $0x22] sm:$0xff]  ;;  %v479_v16 = vld [vmem:[#allocation2 + $0x2a] sm:$0xff]  ;;  %424 = vst.msk [vmem:[#allocation3 + $0x70] sm:$0xff] %vm344_vm3, %v360_v13  ;;  %3292 = vmatprep.subr.mxu0 %v3978_v59 }
 0x12a   :  { %v430_v17 = vld [vmem:[#allocation2 + $0x29] sm:$0xff]  ;;  %542 = vst.msk [vmem:[#allocation3 + $0x48] sm:$0xff] %vm344_vm3, %v478_v15  ;;  %543 = vst.msk [vmem:[#allocation3 + $0x58] sm:$0xff] %vm344_vm3, %v479_v16  ;;  %v549_v19 = vld [vmem:[#allocation3 + $0x18] sm:$0xff]  ;;  %453 = vrot.lane.b32.xlu0 %v431_v12, %s3778_s1  ;;  %3293 = vmatpush3.msra.mxu0 %v3984_v60 }
 0x12b   :  { %451 = vrot.lane.b32.xlu1 %v430_v17, %s3778_s1  ;;  %v358_v20 = vld [vmem:[#allocation2 + $0x28] sm:$0xff]  ;;  %545 = vst.msk [vmem:[#allocation3 + $0x78] sm:$0xff] %vm344_vm3, %v537_v14  ;;  %v563_v21 = vpack.c.bf16 %v549_v19, %v547_v18  ;;  %v359_v22 = vld [vmem:[#allocation2 + $0x30] sm:$0xff]  ;;  %v432_v23 = vld [vmem:[#allocation2 + $0x39] sm:$0xff]  ;;  %3294 = vmatprep.subr.mxu0 %v3990_v61 }
 0x12c   :  { %422 = vst.msk [vmem:[#allocation3 + $0x50] sm:$0xff] %vm344_vm3, %v358_v20  ;;  %423 = vst.msk [vmem:[#allocation3 + $0x60] sm:$0xff] %vm344_vm3, %v359_v22  ;;  %v3996_v62 = vld [vmem:[%s5227_s10 + $0x60] sm:$0xff]  ;;  %v4002_v63 = vld [vmem:[%s5227_s10 + $0xd8] sm:$0xff] }
 0x12d   :  { %3178 = vmatprep.mubr.msk.bf16.mxu1 %vm344_vm3, %v563_v21  ;;  %3295 = vmatpush3.msra.mxu0 %v3996_v62  ;;  %v4008_v0 = vld [vmem:[%s5227_s10 + $0x58] sm:$0xff]  ;;  %v4014_v3 = vld [vmem:[%s5227_s10 + $0xd0] sm:$0xff]  ;;  %v4026_v5 = vld [vmem:[%s5227_s10 + $0xc8] sm:$0xff] }
 0x12e   :  { %v553_v30 = vld [vmem:[#allocation3 + $0x38] sm:$0xff]  ;;  %v559_v48 = vld [vmem:[#allocation3 + $0x68] sm:$0xff]  ;;  %3296 = vmatprep.subr.mxu0 %v4002_v63  ;;  %v4032_v8 = vld [vmem:[%s5227_s10 + $0x48] sm:$0xff] }
 0x12f   :  { %455 = vrot.lane.b32.xlu1 %v432_v23, %s3778_s1  ;;  %v565_v37 = vpack.c.bf16 %v553_v30, %v551_v36  ;;  %3297 = vmatpush3.msra.mxu0 %v4008_v0  ;;  %v4020_v4 = vld [vmem:[%s5227_s10 + $0x50] sm:$0xff]  ;;  %v4038_v9 = vld [vmem:[%s5227_s10 + $0xc0] sm:$0xff]  ;;  %v4050_v11 = vld [vmem:[%s5227_s10 + $0xb8] sm:$0xff]  ;;  %v4150_v36 = vsub.s32 1, %v3883_v24 }
 0x130   :  { %3298 = vmatprep.subr.mxu0 %v4014_v3  ;;  %v4044_v10 = vld [vmem:[%s5227_s10 + $0x40] sm:$0xff]  ;;  %v4056_v12 = vld [vmem:[%s5227_s10 + $0x38] sm:$0xff]  ;;  %v4062_v13 = vld [vmem:[%s5227_s10 + $0xb0] sm:$0xff] }
 0x131   :  { %v555_v40 = vld [vmem:[#allocation3 + $0x48] sm:$0xff]  ;;  %v557_v41 = vld [vmem:[#allocation3 + $0x58] sm:$0xff]  ;;  %3299 = vmatpush3.msra.mxu0 %v4020_v4  ;;  %v4074_v15 = vld [vmem:[%s5227_s10 + $0xa8] sm:$0xff]  ;;  %5248 = vst [vmem:[#allocation24_spill] sm:$0xff] %v4150_v36 }
 0x132   :  { %v567_v44 = vpack.c.bf16 %v557_v41, %v555_v40  ;;  %v561_v49 = vld [vmem:[#allocation3 + $0x78] sm:$0xff]  ;;  %3300 = vmatprep.subr.mxu0 %v4026_v5  ;;  %v4068_v14 = vld [vmem:[%s5227_s10 + $0x30] sm:$0xff]  ;;  %v4080_v16 = vld [vmem:[%s5227_s10 + $0x28] sm:$0xff] }
 0x133   :  { %v569_v51 = vpack.c.bf16 %v561_v49, %v559_v48  ;;  %3301 = vmatpush3.msra.mxu0 %v4032_v8  ;;  %v4086_v17 = vld [vmem:[%s5227_s10 + $0xa0] sm:$0xff]  ;;  %v4098_v19 = vld [vmem:[%s5227_s10 + $0x98] sm:$0xff]  ;;  %v4110_v21 = vld [vmem:[%s5227_s10 + $0x90] sm:$0xff] }
 0x134   :  { %3302 = vmatprep.subr.mxu0 %v4038_v9  ;;  %v4092_v18 = vld [vmem:[%s5227_s10 + $0x20] sm:$0xff]  ;;  %v4104_v20 = vld [vmem:[%s5227_s10 + $0x18] sm:$0xff]  ;;  %v4116_v22 = vld [vmem:[%s5227_s10 + $0x10] sm:$0xff] }
 0x135   :  { %3303 = vmatpush3.msra.mxu0 %v4044_v10  ;;  %v4121_v23 = vld [vmem:[%s5227_s10 + $0x88] sm:$0xff] }
 0x136   :  { %3304 = vmatprep.subr.mxu0 %v4050_v11 }
 0x137   :  { %3305 = vmatpush3.msra.mxu0 %v4056_v12 }
 0x138   :  { %3306 = vmatprep.subr.mxu0 %v4062_v13 }
 0x139   :  { %3307 = vmatpush3.msra.mxu0 %v4068_v14 }
 0x13a   :  { %3308 = vmatprep.subr.mxu0 %v4074_v15 }
 0x13b   :  { %3309 = vmatpush3.msra.mxu0 %v4080_v16 }
 0x13c   :  { %3310 = vmatprep.subr.mxu0 %v4086_v17 }
 0x13d   :  { %3311 = vmatpush3.msra.mxu0 %v4092_v18 }
 0x13e   :  { %3312 = vmatprep.subr.mxu0 %v4098_v19 }
 0x13f   :  { %3313 = vmatpush3.msra.mxu0 %v4104_v20 }
 0x140   :  { %3314 = vmatprep.subr.mxu0 %v4110_v21 }
 0x141   :  { %3315 = vmatpush3.msra.mxu0 %v4116_v22 }
 0x142   :  { %3316 = vmatprep.subr.mxu0 %v4121_v23 }
 0x18d   :  { %v446_v25 = vpop.permute.xlu1 %445 }
 0x18e   :  { %468 = vst.msk [vmem:[#allocation3 + $0x20] sm:$0xff] %vm465_vm8, %v446_v25  ;;  %v4126_v25 = vld [vmem:[%s5227_s10 + $0x8] sm:$0xff] }
 0x18f   :  { %v442_v26 = vpop.permute.xlu0 %441  ;;  %3317 = vmatpush3.msra.mxu0 %v4126_v25 }
 0x190   :  { %466 = vst.msk [vmem:[#allocation3] sm:$0xff] %vm465_vm8, %v442_v26  ;;  %v4132_v26 = vld [vmem:[%s5227_s10 + $0x80] sm:$0xff] }
 0x191   :  { %3318 = vmatprep.subr.mxu0 %v4132_v26 }
 0x192   :  { %v448_v27 = vpop.permute.xlu1 %447 }
 0x193   :  { %469 = vst.msk [vmem:[#allocation3 + $0x30] sm:$0xff] %vm465_vm8, %v448_v27  ;;  %v4138_v27 = vld [vmem:[%s5227_s10] sm:$0xff] }
 0x194   :  { %v444_v28 = vpop.permute.xlu0 %443  ;;  %3319 = vmatpush3.msra.mxu0 %v4138_v27 }
 0x195   :  { %467 = vst.msk [vmem:[#allocation3 + $0x10] sm:$0xff] %vm465_vm8, %v444_v28  ;;  %v550_v42 = vld [vmem:[#allocation3 + $0x20] sm:$0xff] }
 0x197   :  { %v546_v33 = vld [vmem:[#allocation3] sm:$0xff] }
 0x198   :  { %v450_v29 = vpop.permute.xlu0 %449 }
 0x199   :  { %470 = vst.msk [vmem:[#allocation3 + $0x40] sm:$0xff] %vm465_vm8, %v450_v29 }
 0x19a   :  { %v552_v39 = vld [vmem:[#allocation3 + $0x30] sm:$0xff] }
 0x19b   :  { %v564_v43 = vpack.c.bf16 %v552_v39, %v550_v42 }
 0x19c   :  { %v454_v32 = vpop.permute.xlu0 %453  ;;  %v548_v34 = vld [vmem:[#allocation3 + $0x10] sm:$0xff] }
 0x19d   :  { %v452_v31 = vpop.permute.xlu1 %451  ;;  %472 = vst.msk [vmem:[#allocation3 + $0x60] sm:$0xff] %vm465_vm8, %v454_v32  ;;  %v562_v35 = vpack.c.bf16 %v548_v34, %v546_v33  ;;  %v4144_v33 = vsub.s32 0, %v3883_v24  ;;  %v594_v34 = vld [vmem:[%s5220_s3] sm:$0x3] }
 0x19e   :  { %471 = vst.msk [vmem:[#allocation3 + $0x50] sm:$0xff] %vm465_vm8, %v452_v31  ;;  %v603_v40 = vrot.slane %v594_v34, %v4150_v36 }
 0x19f   :  { %771 = vmatmul.mubr.bf16.vlgmr.msra.gmra.mxu1 %v562_v35 }
 0x1a0   :  { %3179 = vmatprep.mubr.msk.bf16.mxu1 %vm344_vm3, %v565_v37  ;;  %v554_v45 = vld [vmem:[#allocation3 + $0x40] sm:$0xff] }
 0x1a1   :  { %v456_v38 = vpop.permute.xlu1 %455 }
 0x1a2   :  { %473 = vst.msk [vmem:[#allocation3 + $0x70] sm:$0xff] %vm465_vm8, %v456_v38  ;;  %v599_v38 = vrot.slane %v594_v34, %v4144_v33 }
 0x1a4   :  { %v558_v53 = vld [vmem:[#allocation3 + $0x60] sm:$0xff] }
 0x1a5   :  { %v556_v46 = vld [vmem:[#allocation3 + $0x50] sm:$0xff] }
 0x1a6   :  { %v566_v50 = vpack.c.bf16 %v556_v46, %v554_v45 }
 0x1a7   :  { %781 = vmatmul.mubr.bf16.gmra.mxu1 %v564_v43 }
 0x1a8   :  { %3180 = vmatprep.mubr.msk.bf16.mxu1 %vm344_vm3, %v567_v44 }
 0x1a9   :  { %v560_v52 = vld [vmem:[#allocation3 + $0x70] sm:$0xff] }
 0x1aa   :  { %v568_v54 = vpack.c.bf16 %v560_v52, %v558_v53 }
 0x1af   :  { %791 = vmatmul.mubr.bf16.gmra.mxu1 %v566_v50 }
 0x1b0   :  { %3181 = vmatprep.mubr.msk.bf16.mxu1 %vm344_vm3, %v569_v51 }
 0x1b7   :  { %801 = vmatmul.mubr.bf16.gmra.mxu1 %v568_v54 }
 0x25f   :  { %v772_v28 = vpop.f32.mrf.mxu1 }
 0x260   :  { %v4156_v43 = vadd.f32 %v772_v28, %v599_v38 }
 0x261   :  { %v774_v29 = vpop.f32.mrf.mxu1 }
 0x262   :  { %v4162_v48 = vadd.f32 %v774_v29, %v603_v40 }
 0x263   :  { %v776_v30 = vpop.f32.mrf.mxu1 }
 0x264   :  { %v4154_v41 = vadd.f32 %v776_v30, %v599_v38 }
 0x265   :  { %v778_v31 = vpop.f32.mrf.mxu1 }
 0x266   :  { %v4158_v44 = vadd.f32 %v778_v31, %v603_v40  ;;  %v813_v24 = vadd.f32 %v4154_v41, %v4156_v43 }
 0x267   :  { %v782_v32 = vpop.f32.mrf.mxu1 }
 0x268   :  { %v4160_v45 = vadd.f32 %v782_v32, %v599_v38  ;;  %v826_v52 = vadd.f32 %v4158_v44, %v4162_v48 }
 0x269   :  { %v784_v35 = vpop.f32.mrf.mxu1 }
 0x26a   :  { %v4166_v49 = vadd.f32 %v784_v35, %v603_v40  ;;  %v814_v53 = vadd.f32 %v813_v24, %v4160_v45 }
 0x26b   :  { %v786_v37 = vpop.f32.mrf.mxu1 }
 0x26c   :  { %v4168_v50 = vadd.f32 %v786_v37, %v599_v38  ;;  %v827_v29 = vadd.f32 %v826_v52, %v4166_v49 }
 0x26d   :  { %v788_v39 = vpop.f32.mrf.mxu1 }
 0x26e   :  { %v4173_v54 = vadd.f32 %v788_v39, %v603_v40  ;;  %v815_v31 = vadd.f32 %v814_v53, %v4168_v50 }
 0x26f   :  { %v792_v42 = vpop.f32.mrf.mxu1 }
 0x270   :  { %v4175_v28 = vadd.f32 %v792_v42, %v599_v38  ;;  %v828_v37 = vadd.f32 %v827_v29, %v4173_v54 }
 0x271   :  { %v794_v46 = vpop.f32.mrf.mxu1 }
 0x272   :  { %5249 = vst [vmem:[#allocation25_spill] sm:$0xff] %v4175_v28  ;;  %v4179_v32 = vadd.f32 %v794_v46, %v603_v40  ;;  %v816_v6 = vadd.f32 %v815_v31, %v4175_v28 }
 0x273   :  { %v796_v51 = vpop.f32.mrf.mxu1 }
 0x274   :  { %v4181_v34 = vadd.f32 %v796_v51, %v599_v38  ;;  %v829_v24 = vadd.f32 %v828_v37, %v4179_v32 }
 0x275   :  { %v798_v30 = vpop.f32.mrf.mxu1 }
 0x276   :  { %5250 = vst [vmem:[#allocation26_spill] sm:$0xff] %v4181_v34  ;;  %v4185_v1 = vadd.f32 %v798_v30, %v603_v40  ;;  %v817_v52 = vadd.f32 %v816_v6, %v4181_v34 }
 0x277   :  { %v802_v35 = vpop.f32.mrf.mxu1 }
 0x278   :  { %5251 = vst [vmem:[#allocation27_spill] sm:$0xff] %v4185_v1  ;;  %v4187_v39 = vadd.f32 %v802_v35, %v599_v38  ;;  %v830_v51 = vadd.f32 %v829_v24, %v4185_v1 }
 0x279   :  { %v804_v42 = vpop.f32.mrf.mxu1 }
 0x27a   :  { %5252 = vst [vmem:[#allocation28_spill] sm:$0xff] %v4187_v39  ;;  %v4191_v47 = vadd.f32 %v804_v42, %v603_v40  ;;  %v818_v53 = vadd.f32 %v817_v52, %v4187_v39 }
 0x27b   :  { %v806_v46 = vpop.f32.mrf.mxu1 }
 0x27c   :  { %v4195_v7 = vadd.f32 %v806_v46, %v599_v38  ;;  %v831_v30 = vadd.f32 %v830_v51, %v4191_v47  ;;  %v5253_v51 = vmov 0.0  }
 0x27d   :  { %v808_v29 = vpop.f32.mrf.mxu1 }
 0x27e   :  { %v819_v31 = vadd.f32 %v818_v53, %v4195_v7  ;;  %v4199_v35 = vadd.f32 %v808_v29, %v603_v40  ;;  %v943_v40 = vld [vmem:[#allocation14 + $0x8] sm:$0xff]  ;;  %v4203_v53 = vld [vmem:[#allocation14] sm:$0xff] }
 0x27f   :  { %978 = vmatprep.subr.mxu0 %v943_v40 }
 0x280   :  { %v820_v2 = vrot.slane %v819_v31, 4  ;;  %v832_v37 = vadd.f32 %v831_v30, %v4199_v35 }
 0x282   :  { %v821_v6 = vadd.f32 %v820_v2, %v819_v31  ;;  %v833_v42 = vrot.slane %v832_v37, 4 }
 0x284   :  { %v822_v36 = vrot.slane %v821_v6, 2  ;;  %v834_v34 = vadd.f32 %v833_v42, %v832_v37 }
 0x286   :  { %v823_v28 = vadd.f32 %v822_v36, %v821_v6  ;;  %v835_v24 = vrot.slane %v834_v34, 2 }
 0x288   :  { %v836_v1 = vadd.f32 %v835_v24, %v834_v34  ;;  %v824_v52 = vrot.slane %v823_v28, 1 }
 0x28a   :  { %v837_v38 = vrot.slane %v836_v1, 1  ;;  %v825_v39 = vadd.f32 %v824_v52, %v823_v28 }
 0x28c   :  { %v838_v46 = vadd.f32 %v837_v38, %v836_v1 }
 0x28e   :  { %935 = vmatprep.mubr.f32.mxu0 %v838_v46 }
 0x28f   :  { %936 = vmatmul.mubr.f32.vlgmr.msra.gmra.mxu0 %v825_v39 }
 0x290   :  { %1012 = vmatprep.mubr.f32.mxu0 %v5253_v51  ;;  %979 = vmatpush1.msra.mxu0 %v4203_v53 }
 0x291   :  { %3323 = vmatprep.subr.mxu0 %v3954_v55 }
 0x34f   :  { %v3320_v2 = vpop.f32.mrf.mxu0 }
 0x351   :  { %v3321_v36 = vpop.f32.mrf.mxu0 }
 0x352   :  { %v3322_v29 = vadd.f32 %v3321_v36, %v3320_v2 }
 0x354   :  { %v941_v34 = vmul.f32 0.00048828125, %v3322_v29 }
 0x356   :  { %3182 = vmatmul.mubr.msk.f32.vlgmr.msra.gmra.mxu0 %vm944_vm9, %v941_v34 }
 0x357   :  { %3324 = vmatpush3.msra.mxu0 %v3960_v56 }
 0x358   :  { %3325 = vmatprep.subr.mxu0 %v3966_v57 }
 0x359   :  { %3326 = vmatpush3.msra.mxu0 %v3972_v58 }
 0x35a   :  { %3327 = vmatprep.subr.mxu0 %v3978_v59 }
 0x35b   :  { %3328 = vmatpush3.msra.mxu0 %v3984_v60 }
 0x35c   :  { %3329 = vmatprep.subr.mxu0 %v3990_v61 }
 0x35d   :  { %3330 = vmatpush3.msra.mxu0 %v3996_v62 }
 0x35e   :  { %3331 = vmatprep.subr.mxu0 %v4002_v63 }
 0x35f   :  { %3332 = vmatpush3.msra.mxu0 %v4008_v0 }
 0x360   :  { %3333 = vmatprep.subr.mxu0 %v4014_v3 }
 0x361   :  { %3334 = vmatpush3.msra.mxu0 %v4020_v4 }
 0x362   :  { %3335 = vmatprep.subr.mxu0 %v4026_v5 }
 0x363   :  { %3336 = vmatpush3.msra.mxu0 %v4032_v8 }
 0x364   :  { %3337 = vmatprep.subr.mxu0 %v4038_v9 }
 0x365   :  { %3338 = vmatpush3.msra.mxu0 %v4044_v10 }
 0x366   :  { %3339 = vmatprep.subr.mxu0 %v4050_v11 }
 0x367   :  { %3340 = vmatpush3.msra.mxu0 %v4056_v12 }
 0x368   :  { %3341 = vmatprep.subr.mxu0 %v4062_v13  ;;  %v5254_v13 = vld [vmem:[#allocation27_spill] sm:$0xff] }
 0x369   :  { %3342 = vmatpush3.msra.mxu0 %v4068_v14 }
 0x36a   :  { %3343 = vmatprep.subr.mxu0 %v4074_v15  ;;  %v5255_v15 = vld [vmem:[#allocation25_spill] sm:$0xff] }
 0x36b   :  { %3344 = vmatpush3.msra.mxu0 %v4080_v16 }
 0x36c   :  { %3345 = vmatprep.subr.mxu0 %v4086_v17 }
 0x36d   :  { %3346 = vmatpush3.msra.mxu0 %v4092_v18 }
 0x36e   :  { %3347 = vmatprep.subr.mxu0 %v4098_v19 }
 0x36f   :  { %3348 = vmatpush3.msra.mxu0 %v4104_v20 }
 0x370   :  { %3349 = vmatprep.subr.mxu0 %v4110_v21 }
 0x371   :  { %3350 = vmatpush3.msra.mxu0 %v4116_v22  ;;  %v5256_v22 = vld [vmem:[#allocation26_spill] sm:$0xff] }
 0x372   :  { %3351 = vmatprep.subr.mxu0 %v4121_v23 }
 0x373   :  { %3352 = vmatpush3.msra.mxu0 %v4126_v25 }
 0x374   :  { %3353 = vmatprep.subr.mxu0 %v4132_v26 }
 0x375   :  { %3354 = vmatpush3.msra.mxu0 %v4138_v27 }
 0x376   :  { %1191 = vmatprep.subr.mxu0 %v943_v40 }
 0x416   :  { %v1014_v1 = vpop.f32.mrf.mxu0 }
 0x417   :  { %v1022_v55 = vrot.slane %v1014_v1, %v4144_v33 }
 0x418   :  { %v1016_v56 = vpop.f32.mrf.mxu0 }
 0x419   :  { %v1026_v57 = vrot.slane %v1016_v56, %v4144_v33  ;;  %v4242_v58 = vsub.f32 %v4156_v43, %v1022_v55  ;;  %v4254_v62 = vsub.f32 %v4154_v41, %v1022_v55  ;;  %v4264_v4 = vsub.f32 %v4160_v45, %v1022_v55 }
 0x41a   :  { %v4270_v8 = vsub.f32 %v4168_v50, %v1022_v55  ;;  %v4282_v16 = vsub.f32 %v5255_v15, %v1022_v55  ;;  %v4292_v23 = vsub.f32 %v5256_v22, %v1022_v55  ;;  %v3513_v15 = vld [vmem:[%s5223_s6 + $0x44] ss:$8 sps:$4 sm:$0xff]   ;;  %v3523_v22 = vld [vmem:[%s5223_s6 + $0x20] ss:$8 sps:$4 sm:$0xff]  }
 0x41b   :  { %v4245_v59 = vsub.f32 %v4162_v48, %v1026_v57  ;;  %v4248_v60 = vsub.f32 %v4158_v44, %v1026_v57  ;;  %v4251_v61 = vsub.f32 %v4166_v49, %v1026_v57  ;;  %v4257_v63 = vsub.f32 %v4173_v54, %v1026_v57  ;;  %v5257_v44 = vld [vmem:[#allocation28_spill] sm:$0xff] }
 0x41c   :  { %v4267_v5 = vsub.f32 %v4179_v32, %v1026_v57  ;;  %v1043_v11 = vmul.f32 %v4242_v58, %v4242_v58  ;;  %v1045_v12 = vmul.f32 %v4254_v62, %v4254_v62  ;;  %v4279_v14 = vsub.f32 %v5254_v13, %v1026_v57  ;;  %v3505_v13 = vld [vmem:[%s5223_s6 + $0x50] ss:$8 sps:$4 sm:$0xff]  }
 0x41d   :  { %v1044_v0 = vmul.f32 %v4245_v59, %v4245_v59  ;;  %v1046_v3 = vmul.f32 %v4248_v60, %v4248_v60  ;;  %v1048_v9 = vmul.f32 %v4251_v61, %v4251_v61  ;;  %v1050_v17 = vmul.f32 %v4257_v63, %v4257_v63 }
 0x41e   :  { %v1047_v19 = vmul.f32 %v4264_v4, %v4264_v4  ;;  %v1059_v20 = vadd.f32 %v1045_v12, %v1043_v11  ;;  %v4289_v21 = vsub.f32 %v4191_v47, %v1026_v57  ;;  %v1052_v25 = vmul.f32 %v4267_v5, %v4267_v5  ;;  %v3501_v11 = vld [vmem:[%s5223_s6 + $0x64] ss:$8 sps:$4 sm:$0xff]   ;;  %v3507_v12 = vld [vmem:[%s5223_s6 + $0x54] ss:$8 sps:$4 sm:$0xff]  }
 0x41f   :  { %v1072_v10 = vadd.f32 %v1046_v3, %v1044_v0  ;;  %v1049_v27 = vmul.f32 %v4270_v8, %v4270_v8  ;;  %v4299_v43 = vsub.f32 %v4199_v35, %v1026_v57  ;;  %v4302_v45 = vsub.f32 %v5257_v44, %v1022_v55  ;;  %v3493_v3 = vld [vmem:[%s5223_s6 + $0x70] ss:$8 sps:$4 sm:$0xff]   ;;  %v3543_v44 = vld [vmem:[%s5223_s6 + $0xf4] ss:$8 sps:$4 sm:$0xff]  }
 0x420   :  { %v1060_v41 = vadd.f32 %v1059_v20, %v1047_v19  ;;  %v1054_v47 = vmul.f32 %v4279_v14, %v4279_v14  ;;  %v1051_v49 = vmul.f32 %v4282_v16, %v4282_v16  ;;  %v1056_v54 = vmul.f32 %v4289_v21, %v4289_v21  ;;  %v3517_v19 = vld [vmem:[%s5223_s6 + $0x30] ss:$8 sps:$4 sm:$0xff]   ;;  %v3525_v20 = vld [vmem:[%s5223_s6 + $0x24] ss:$8 sps:$4 sm:$0xff]  }
 0x421   :  { %v1073_v18 = vadd.f32 %v1072_v10, %v1048_v9  ;;  %v4311_v32 = vsub.f32 %v4195_v7, %v1022_v55  ;;  %v1053_v39 = vmul.f32 %v4292_v23, %v4292_v23  ;;  %v1058_v31 = vmul.f32 %v4299_v43, %v4299_v43  ;;  %v3495_v9 = vld [vmem:[%s5223_s6 + $0x74] ss:$8 sps:$4 sm:$0xff]  }
 0x422   :  { %v1061_v50 = vadd.f32 %v1060_v41, %v1049_v27  ;;  %v1055_v37 = vmul.f32 %v4302_v45, %v4302_v45  ;;  %v3498_v10 = vld [vmem:[%s5223_s6 + $0x174] ss:$8 sps:$4 sm:$0xff]   ;;  %2383 = vmatprep.subr.bf16.mxu1 %v3495_v9  ;;  %v3537_v27 = vld [vmem:[%s5223_s6 + $0x4] ss:$8 sps:$4 sm:$0xff]   ;;  %v3535_v41 = vld [vmem:[%s5223_s6] ss:$8 sps:$4 sm:$0xff]  }
 0x423   :  { %v1074_v26 = vadd.f32 %v1073_v18, %v1050_v17  ;;  %v1057_v24 = vmul.f32 %v4311_v32, %v4311_v32  ;;  %2384 = vmatpush1.bf16.msra.mxu1 %v3493_v3  ;;  %v3511_v17 = vld [vmem:[%s5223_s6 + $0x40] ss:$8 sps:$4 sm:$0xff]   ;;  %v3519_v18 = vld [vmem:[%s5223_s6 + $0x34] ss:$8 sps:$4 sm:$0xff]   ;;  %v3553_v9 = vld [vmem:[%s5223_s6 + $0xd0] ss:$8 sps:$4 sm:$0xff]  }
 0x424   :  { %v1062_v30 = vadd.f32 %v1061_v50, %v1051_v49  ;;  %2385 = vmatprep.subr.bf16.mxu1 %v3501_v11  ;;  %v3547_v49 = vld [vmem:[%s5223_s6 + $0xe0] ss:$8 sps:$4 sm:$0xff]   ;;  %v3555_v3 = vld [vmem:[%s5223_s6 + $0xd4] ss:$8 sps:$4 sm:$0xff]   ;;  %v3556_v11 = vld [vmem:[%s5223_s6 + $0x1d0] ss:$8 sps:$4 sm:$0xff]  }
 0x425   :  { %v1075_v48 = vadd.f32 %v1074_v26, %v1052_v25  ;;  %v3531_v25 = vld [vmem:[%s5223_s6 + $0x14] ss:$8 sps:$4 sm:$0xff]   ;;  %v3529_v26 = vld [vmem:[%s5223_s6 + $0x10] ss:$8 sps:$4 sm:$0xff]  }
 0x426   :  { %v1063_v6 = vadd.f32 %v1062_v30, %v1053_v39 }
 0x427   :  { %v1076_v28 = vadd.f32 %v1075_v48, %v1054_v47  ;;  %v3541_v47 = vld [vmem:[%s5223_s6 + $0xf0] ss:$8 sps:$4 sm:$0xff]   ;;  %v3549_v48 = vld [vmem:[%s5223_s6 + $0xe4] ss:$8 sps:$4 sm:$0xff]  }
 0x428   :  { %v1064_v52 = vadd.f32 %v1063_v6, %v1055_v37  ;;  %v3502_v6 = vld [vmem:[%s5223_s6 + $0x160] ss:$8 sps:$4 sm:$0xff]  }
 0x429   :  { %v1077_v35 = vadd.f32 %v1076_v28, %v1056_v54 }
 0x42a   :  { %v1065_v7 = vadd.f32 %v1064_v52, %v1057_v24  ;;  %v3508_v24 = vld [vmem:[%s5223_s6 + $0x150] ss:$8 sps:$4 sm:$0xff]   ;;  %v3516_v52 = vld [vmem:[%s5223_s6 + $0x144] ss:$8 sps:$4 sm:$0xff]  }
 0x42b   :  { %v1078_v42 = vadd.f32 %v1077_v35, %v1058_v31  ;;  %v3496_v31 = vld [vmem:[%s5223_s6 + $0x170] ss:$8 sps:$4 sm:$0xff]   ;;  %v3504_v35 = vld [vmem:[%s5223_s6 + $0x164] ss:$8 sps:$4 sm:$0xff]  }
 0x42c   :  { %v1066_v40 = vrot.slane %v1065_v7, 4 }
 0x42d   :  { %v1079_v38 = vrot.slane %v1078_v42, 4 }
 0x42e   :  { %v1067_v36 = vadd.f32 %v1066_v40, %v1065_v7  ;;  %v3522_v7 = vld [vmem:[%s5223_s6 + $0x134] ss:$8 sps:$4 sm:$0xff]   ;;  %v3528_v40 = vld [vmem:[%s5223_s6 + $0x124] ss:$8 sps:$4 sm:$0xff]  }
 0x42f   :  { %v1080_v46 = vadd.f32 %v1079_v38, %v1078_v42  ;;  %v3510_v42 = vld [vmem:[%s5223_s6 + $0x154] ss:$8 sps:$4 sm:$0xff]   ;;  %v3514_v38 = vld [vmem:[%s5223_s6 + $0x140] ss:$8 sps:$4 sm:$0xff]  }
 0x430   :  { %v1068_v34 = vrot.slane %v1067_v36, 2 }
 0x431   :  { %v1081_v2 = vrot.slane %v1080_v46, 2 }
 0x432   :  { %v1069_v55 = vadd.f32 %v1068_v34, %v1067_v36  ;;  %v3534_v36 = vld [vmem:[%s5223_s6 + $0x114] ss:$8 sps:$4 sm:$0xff]   ;;  %v3540_v34 = vld [vmem:[%s5223_s6 + $0x104] ss:$8 sps:$4 sm:$0xff]  }
 0x433   :  { %v1082_v29 = vadd.f32 %v1081_v2, %v1080_v46  ;;  %v3520_v46 = vld [vmem:[%s5223_s6 + $0x130] ss:$8 sps:$4 sm:$0xff]   ;;  %v3526_v2 = vld [vmem:[%s5223_s6 + $0x120] ss:$8 sps:$4 sm:$0xff]  }
 0x434   :  { %v1070_v57 = vrot.slane %v1069_v55, 1 }
 0x435   :  { %v1083_v1 = vrot.slane %v1082_v29, 1 }
 0x436   :  { %v1071_v0 = vadd.f32 %v1070_v57, %v1069_v55  ;;  %v3546_v55 = vld [vmem:[%s5223_s6 + $0x1f4] ss:$8 sps:$4 sm:$0xff]   ;;  %v3552_v57 = vld [vmem:[%s5223_s6 + $0x1e4] ss:$8 sps:$4 sm:$0xff]  }
 0x437   :  { %v1084_v56 = vadd.f32 %v1083_v1, %v1082_v29  ;;  %v3532_v29 = vld [vmem:[%s5223_s6 + $0x110] ss:$8 sps:$4 sm:$0xff]   ;;  %v3538_v1 = vld [vmem:[%s5223_s6 + $0x100] ss:$8 sps:$4 sm:$0xff]  }
 0x439   :  { %1149 = vmatprep.mubr.f32.mxu0 %v1084_v56  ;;  %v3544_v56 = vld [vmem:[%s5223_s6 + $0x1f0] ss:$8 sps:$4 sm:$0xff]  }
 0x43a   :  { %1150 = vmatmul.mubr.f32.vlgmr.msra.gmra.mxu0 %v1071_v0  ;;  %v3550_v0 = vld [vmem:[%s5223_s6 + $0x1e0] ss:$8 sps:$4 sm:$0xff]  }
 0x43b   :  { %1192 = vmatpush1.msra.mxu0 %v4203_v53  ;;  %1225 = vmatprep.mubr.f32.mxu0 %v5253_v51  ;;  %v3499_v53 = vld [vmem:[%s5223_s6 + $0x60] ss:$8 sps:$4 sm:$0xff]  }
 0x43c   :  { %2456 = vmatprep.subr.bf16.mxu0 %v3498_v10  ;;  %2386 = vmatpush1.bf16.msra.mxu1 %v3499_v53  ;;  %v3558_v10 = vld [vmem:[%s5223_s6 + $0x1d4] ss:$8 sps:$4 sm:$0xff]   ;;  %v3561_v53 = vld [vmem:[%s5223_s6 + $0xc4] ss:$8 sps:$4 sm:$0xff]  }
 0x43d   :  { %2387 = vmatprep.subr.bf16.mxu1 %v3507_v12  ;;  %v3559_v12 = vld [vmem:[%s5223_s6 + $0xc0] ss:$8 sps:$4 sm:$0xff]  }
 0x440   :  { %2388 = vmatpush1.bf16.msra.mxu1 %v3505_v13  ;;  %v3564_v13 = vld [vmem:[%s5223_s6 + $0x1c4] ss:$8 sps:$4 sm:$0xff]  }
 0x441   :  { %2389 = vmatprep.subr.bf16.mxu1 %v3513_v15  ;;  %v3562_v15 = vld [vmem:[%s5223_s6 + $0x1c0] ss:$8 sps:$4 sm:$0xff]  }
 0x444   :  { %2390 = vmatpush1.bf16.msra.mxu1 %v3511_v17  ;;  %v3567_v17 = vld [vmem:[%s5223_s6 + $0xb4] ss:$8 sps:$4 sm:$0xff]  }
 0x445   :  { %2391 = vmatprep.subr.bf16.mxu1 %v3519_v18  ;;  %v3565_v18 = vld [vmem:[%s5223_s6 + $0xb0] ss:$8 sps:$4 sm:$0xff]  }
 0x448   :  { %2392 = vmatpush1.bf16.msra.mxu1 %v3517_v19  ;;  %v3570_v19 = vld [vmem:[%s5223_s6 + $0x1b4] ss:$8 sps:$4 sm:$0xff]  }
 0x449   :  { %2393 = vmatprep.subr.bf16.mxu1 %v3525_v20  ;;  %v3568_v20 = vld [vmem:[%s5223_s6 + $0x1b0] ss:$8 sps:$4 sm:$0xff]  }
 0x44c   :  { %2394 = vmatpush1.bf16.msra.mxu1 %v3523_v22  ;;  %v3573_v22 = vld [vmem:[%s5223_s6 + $0xa4] ss:$8 sps:$4 sm:$0xff]  }
 0x44d   :  { %2395 = vmatprep.subr.bf16.mxu1 %v3531_v25  ;;  %v3571_v25 = vld [vmem:[%s5223_s6 + $0xa0] ss:$8 sps:$4 sm:$0xff]  }
 0x450   :  { %2396 = vmatpush1.bf16.msra.mxu1 %v3529_v26  ;;  %v3576_v26 = vld [vmem:[%s5223_s6 + $0x1a4] ss:$8 sps:$4 sm:$0xff]  }
 0x451   :  { %2397 = vmatprep.subr.bf16.mxu1 %v3537_v27  ;;  %v3574_v27 = vld [vmem:[%s5223_s6 + $0x1a0] ss:$8 sps:$4 sm:$0xff]  }
 0x454   :  { %2398 = vmatpush1.bf16.msra.mxu1 %v3535_v41  ;;  %v3577_v41 = vld [vmem:[%s5223_s6 + $0x90] ss:$8 sps:$4 sm:$0xff]  }
 0x455   :  { %2399 = vmatprep.subr.bf16.mxu1 %v3543_v44  ;;  %v3579_v44 = vld [vmem:[%s5223_s6 + $0x94] ss:$8 sps:$4 sm:$0xff]  }
 0x458   :  { %2400 = vmatpush2.bf16.msra.mxu1 %v3541_v47  ;;  %v3582_v47 = vld [vmem:[%s5223_s6 + $0x194] ss:$8 sps:$4 sm:$0xff]  }
 0x459   :  { %2401 = vmatprep.subr.bf16.mxu1 %v3549_v48  ;;  %v3580_v48 = vld [vmem:[%s5223_s6 + $0x190] ss:$8 sps:$4 sm:$0xff]  }
 0x45c   :  { %2402 = vmatpush2.bf16.msra.mxu1 %v3547_v49  ;;  %v3585_v49 = vld [vmem:[%s5223_s6 + $0x84] ss:$8 sps:$4 sm:$0xff]  }
 0x45d   :  { %2403 = vmatprep.subr.bf16.mxu1 %v3555_v3 }
 0x460   :  { %2404 = vmatpush2.bf16.msra.mxu1 %v3553_v9 }
 0x461   :  { %2405 = vmatprep.subr.bf16.mxu1 %v3561_v53 }
 0x464   :  { %2406 = vmatpush2.bf16.msra.mxu1 %v3559_v12 }
 0x465   :  { %2407 = vmatprep.subr.bf16.mxu1 %v3567_v17 }
 0x468   :  { %2408 = vmatpush2.bf16.msra.mxu1 %v3565_v18 }
 0x469   :  { %2409 = vmatprep.subr.bf16.mxu1 %v3573_v22 }
 0x46c   :  { %2410 = vmatpush2.bf16.msra.mxu1 %v3571_v25 }
 0x46d   :  { %2411 = vmatprep.subr.bf16.mxu1 %v3579_v44 }
 0x470   :  { %2412 = vmatpush2.bf16.msra.mxu1 %v3577_v41 }
 0x471   :  { %2413 = vmatprep.subr.bf16.mxu1 %v3585_v49 }
 0x4fa   :  { %v3355_v50 = vpop.f32.mrf.mxu0 }
 0x4fc   :  { %v3356_v54 = vpop.f32.mrf.mxu0 }
 0x4fd   :  { %v3357_v28 = vadd.f32 %v3356_v54, %v3355_v50  ;;  %v3588_v50 = vld [vmem:[%s5223_s6 + $0x184] ss:$8 sps:$4 sm:$0xff]   ;;  %v3583_v54 = vld [vmem:[%s5223_s6 + $0x80] ss:$8 sps:$4 sm:$0xff]  }
 0x4fe   :  { %2414 = vmatpush2.bf16.msra.mxu1 %v3583_v54 }
 0x4ff   :  { %v1155_v39 = vmul.f32 0.00048828125, %v3357_v28  ;;  %v3586_v28 = vld [vmem:[%s5223_s6 + $0x180] ss:$8 sps:$4 sm:$0xff]  }
 0x501   :  { %v1156_v30 = vadd.f32 1e-05, %v1155_v39  ;;  %v3591_v39 = vld [vmem:[%s5223_s6 + $0x274] ss:$8 sps:$4 sm:$0xff]  }
 0x502   :  { %2529 = vmatprep.subr.bf16.mxu1 %v3591_v39 }
 0x503   :  { %3637 = vrsqrt.f32 %v1156_v30  ;;  %v811_v30 = vld [vmem:[%s5221_s4] sm:$0x3] }
 0x510   :  { %v3638_v37 = vpop.eup %3637 }
 0x511   :  { %3183 = vmatmul.mubr.msk.f32.vlgmr.msra.gmra.mxu0 %vm944_vm9, %v3638_v37 }
 0x512   :  { %2457 = vmatpush1.bf16.msra.mxu0 %v3496_v31  ;;  %v812_v31 = vld [vmem:[#allocation8] sm:$0x3] }
 0x513   :  { %2458 = vmatprep.subr.bf16.mxu0 %v3504_v35 }
 0x516   :  { %2459 = vmatpush1.bf16.msra.mxu0 %v3502_v6  ;;  %v1260_v6 = vrot.slane %v811_v30, %v4144_v33 }
 0x517   :  { %2460 = vmatprep.subr.bf16.mxu0 %v3510_v42  ;;  %v1287_v42 = vrot.slane %v812_v31, %v4144_v33 }
 0x51a   :  { %2461 = vmatpush1.bf16.msra.mxu0 %v3508_v24  ;;  %v5258_v24 = vld [vmem:[#allocation24_spill] sm:$0xff] }
 0x51b   :  { %2462 = vmatprep.subr.bf16.mxu0 %v3516_v52  ;;  %v4526_v52 = vrot.slane %v811_v30, %v5258_v24 }
 0x51e   :  { %2463 = vmatpush1.bf16.msra.mxu0 %v3514_v38 }
 0x51f   :  { %2464 = vmatprep.subr.bf16.mxu0 %v3522_v7 }
 0x522   :  { %2465 = vmatpush1.bf16.msra.mxu0 %v3520_v46 }
 0x523   :  { %2466 = vmatprep.subr.bf16.mxu0 %v3528_v40 }
 0x526   :  { %2467 = vmatpush1.bf16.msra.mxu0 %v3526_v2 }
 0x527   :  { %2468 = vmatprep.subr.bf16.mxu0 %v3534_v36 }
 0x52a   :  { %2469 = vmatpush1.bf16.msra.mxu0 %v3532_v29 }
 0x52b   :  { %2470 = vmatprep.subr.bf16.mxu0 %v3540_v34 }
 0x52e   :  { %2471 = vmatpush1.bf16.msra.mxu0 %v3538_v1 }
 0x52f   :  { %2472 = vmatprep.subr.bf16.mxu0 %v3546_v55 }
 0x532   :  { %2473 = vmatpush2.bf16.msra.mxu0 %v3544_v56 }
 0x533   :  { %2474 = vmatprep.subr.bf16.mxu0 %v3552_v57 }
 0x536   :  { %2475 = vmatpush2.bf16.msra.mxu0 %v3550_v0 }
 0x537   :  { %2476 = vmatprep.subr.bf16.mxu0 %v3558_v10 }
 0x53a   :  { %2477 = vmatpush2.bf16.msra.mxu0 %v3556_v11 }
 0x53b   :  { %2478 = vmatprep.subr.bf16.mxu0 %v3564_v13 }
 0x53e   :  { %2479 = vmatpush2.bf16.msra.mxu0 %v3562_v15 }
 0x53f   :  { %2480 = vmatprep.subr.bf16.mxu0 %v3570_v19 }
 0x542   :  { %2481 = vmatpush2.bf16.msra.mxu0 %v3568_v20 }
 0x543   :  { %2482 = vmatprep.subr.bf16.mxu0 %v3576_v26 }
 0x546   :  { %2483 = vmatpush2.bf16.msra.mxu0 %v3574_v27 }
 0x547   :  { %2484 = vmatprep.subr.bf16.mxu0 %v3582_v47 }
 0x54a   :  { %2485 = vmatpush2.bf16.msra.mxu0 %v3580_v48 }
 0x54b   :  { %2486 = vmatprep.subr.bf16.mxu0 %v3588_v50 }
 0x54e   :  { %2487 = vmatpush2.bf16.msra.mxu0 %v3586_v28 }
 0x5d1   :  { %v1227_v35 = vpop.f32.mrf.mxu0 }
 0x5d2   :  { %v1235_v37 = vrot.slane %v1227_v35, %v4144_v33  ;;  %v1291_v35 = vrot.slane %v812_v31, %v5258_v24 }
 0x5d3   :  { %v1229_v20 = vpop.f32.mrf.mxu0 }
 0x5d4   :  { %v1240_v38 = vmul.f32 %v1235_v37, %v4242_v58  ;;  %v1242_v7 = vmul.f32 %v1235_v37, %v4254_v62  ;;  %v1244_v46 = vmul.f32 %v1235_v37, %v4264_v4  ;;  %v1246_v40 = vmul.f32 %v1235_v37, %v4270_v8 }
 0x5d5   :  { %v1248_v2 = vmul.f32 %v1235_v37, %v4282_v16  ;;  %v1250_v36 = vmul.f32 %v1235_v37, %v4292_v23  ;;  %v1252_v29 = vmul.f32 %v1235_v37, %v4302_v45  ;;  %v1254_v34 = vmul.f32 %v1235_v37, %v4311_v32 }
 0x5d6   :  { %v1267_v1 = vmul.f32 %v1260_v6, %v1240_v38  ;;  %v1269_v55 = vmul.f32 %v1260_v6, %v1242_v7  ;;  %v1271_v56 = vmul.f32 %v1260_v6, %v1244_v46  ;;  %v1273_v57 = vmul.f32 %v1260_v6, %v1246_v40 }
 0x5d7   :  { %v1275_v0 = vmul.f32 %v1260_v6, %v1248_v2  ;;  %v1277_v58 = vmul.f32 %v1260_v6, %v1250_v36  ;;  %v1279_v3 = vmul.f32 %v1260_v6, %v1252_v29  ;;  %v1281_v62 = vmul.f32 %v1260_v6, %v1254_v34 }
 0x5d8   :  { %v1294_v9 = vadd.f32 %v1287_v42, %v1267_v1  ;;  %v1296_v4 = vadd.f32 %v1287_v42, %v1269_v55  ;;  %v1298_v10 = vadd.f32 %v1287_v42, %v1271_v56  ;;  %v1300_v8 = vadd.f32 %v1287_v42, %v1273_v57 }
 0x5d9   :  { %v1302_v11 = vadd.f32 %v1287_v42, %v1275_v0  ;;  %v1304_v16 = vadd.f32 %v1287_v42, %v1277_v58  ;;  %v1306_v53 = vadd.f32 %v1287_v42, %v1279_v3  ;;  %v1308_v23 = vadd.f32 %v1287_v42, %v1281_v62 }
 0x5da   :  { %v1310_v12 = vmax.f32 %v1294_v9, 0.0  ;;  %v1312_v45 = vmax.f32 %v1296_v4, 0.0  ;;  %v1314_v13 = vmax.f32 %v1298_v10, 0.0  ;;  %v1316_v32 = vmax.f32 %v1300_v8, 0.0 }
 0x5db   :  { %v1318_v15 = vmax.f32 %v1302_v11, 0.0  ;;  %v1320_v17 = vmax.f32 %v1304_v16, 0.0  ;;  %v1322_v18 = vmax.f32 %v1306_v53, 0.0  ;;  %v1324_v19 = vmax.f32 %v1308_v23, 0.0 }
 0x5dc   :  { %v1352_v22 = vrot.slane %v1310_v12, 7  ;;  %v1354_v25 = vrot.slane %v1312_v45, 7  ;;  %v1358_v26 = vrot.slane %v1314_v13, 7  ;;  %v1362_v27 = vrot.slane %v1316_v32, 7 }
 0x5dd   :  { %v4536_v41 = vrot.slane %v1318_v15, 7  ;;  %v4538_v44 = vrot.slane %v1320_v17, 7  ;;  %v4540_v47 = vrot.slane %v1322_v18, 7  ;;  %v4542_v48 = vrot.slane %v1324_v19, 7 }
 0x5de   :  { %v4545_v49 = vsel %vm1351_vm10, %v1352_v22, %v1354_v25  ;;  %v4548_v50 = vsel %vm1351_vm10, %v1354_v25, %v1358_v26  ;;  %1400 = vst [vmem:[#allocation4] sm:$0xfe] %v1352_v22  ;;  %v1239_v54 = vrot.slane %v1229_v20, %v4144_v33  ;;  %v4552_v28 = vsel %vm1351_vm10, %v1358_v26, %v1362_v27  ;;  %v5259_v22 = vld [vmem:[#allocation22_spill] sm:$0xff] }
 0x5df   :  { %v4556_v39 = vsel %vm1351_vm10, %v1362_v27, %v4536_v41  ;;  %v4561_v30 = vsel %vm1351_vm10, %v4538_v44, %v4540_v47  ;;  %1416 = vst [vmem:[#allocation4 + $0x80] sm:$0x1] %v4542_v48  ;;  %v3779_v37 = vmov 1.0   ;;  %v1601_v25 = vrot.slane %v5259_v22, 6 }
 0x5e0   :  { %v4565_v6 = vrot.slane %v3779_v37, 6  ;;  %v1241_v42 = vmul.f32 %v1239_v54, %v4245_v59  ;;  %v1243_v38 = vmul.f32 %v1239_v54, %v4248_v60  ;;  %v1245_v7 = vmul.f32 %v1239_v54, %v4251_v61  ;;  %v5261_v37 = vld [vmem:[#allocation20_spill] sm:$0xff] }
 0x5e1   :  { %v1247_v46 = vmul.f32 %v1239_v54, %v4257_v63  ;;  %v1249_v40 = vmul.f32 %v1239_v54, %v4267_v5  ;;  %v1251_v2 = vmul.f32 %v1239_v54, %v4279_v14  ;;  %v1253_v36 = vmul.f32 %v1239_v54, %v4289_v21 }
 0x5e2   :  { %v1255_v29 = vmul.f32 %v1239_v54, %v4299_v43  ;;  %v1268_v31 = vmul.f32 %v4526_v52, %v1241_v42  ;;  %v1270_v34 = vmul.f32 %v4526_v52, %v1243_v38  ;;  %v1272_v59 = vmul.f32 %v4526_v52, %v1245_v7  ;;  %v5260_v54 = vld [vmem:[#allocation23_spill] sm:$0xff] }
 0x5e3   :  { %v1274_v60 = vmul.f32 %v4526_v52, %v1247_v46  ;;  %v1276_v61 = vmul.f32 %v4526_v52, %v1249_v40  ;;  %v1278_v63 = vmul.f32 %v4526_v52, %v1251_v2  ;;  %v1280_v5 = vmul.f32 %v4526_v52, %v1253_v36 }
 0x5e4   :  { %v1282_v14 = vmul.f32 %v4526_v52, %v1255_v29  ;;  %v1295_v1 = vadd.f32 %v1291_v35, %v1268_v31  ;;  %v1297_v21 = vadd.f32 %v1291_v35, %v1270_v34  ;;  %v1299_v55 = vadd.f32 %v1291_v35, %v1272_v59 }
 0x5e5   :  { %v1301_v43 = vadd.f32 %v1291_v35, %v1274_v60  ;;  %v1303_v56 = vadd.f32 %v1291_v35, %v1276_v61  ;;  %v1305_v57 = vadd.f32 %v1291_v35, %v1278_v63  ;;  %v1307_v0 = vadd.f32 %v1291_v35, %v1280_v5  ;;  %v1418_v17 = vld [vmem:[#allocation4] sm:$0xff] }
 0x5e6   :  { %v1309_v58 = vadd.f32 %v1291_v35, %v1282_v14  ;;  %v1311_v3 = vmax.f32 %v1295_v1, 0.0  ;;  %v1313_v62 = vmax.f32 %v1297_v21, 0.0  ;;  %v1315_v9 = vmax.f32 %v1299_v55, 0.0  ;;  %v1466_v38 = vld [vmem:[#allocation4] sm:$0xfe] }
 0x5e7   :  { %v1317_v4 = vmax.f32 %v1301_v43, 0.0  ;;  %v1319_v10 = vmax.f32 %v1303_v56, 0.0  ;;  %v1321_v8 = vmax.f32 %v1305_v57, 0.0  ;;  %v1323_v11 = vmax.f32 %v1307_v0, 0.0 }
 0x5e8   :  { %v1325_v16 = vmax.f32 %v1309_v58, 0.0  ;;  %v1353_v53 = vrot.slane %v1311_v3, 7  ;;  %v1356_v23 = vrot.slane %v1313_v62, 7  ;;  %v1360_v12 = vrot.slane %v1315_v9, 7 }
 0x5e9   :  { %v1364_v52 = vrot.slane %v1317_v4, 7  ;;  %v1368_v45 = vrot.slane %v1319_v10, 7  ;;  %v1372_v13 = vrot.slane %v1321_v8, 7  ;;  %v1376_v32 = vrot.slane %v1323_v11, 7  ;;  %v5262_v8 = vld [vmem:[#allocation21_spill] sm:$0xff] }
 0x5ea   :  { %v1380_v15 = vrot.slane %v1325_v16, 7  ;;  %1401 = vst [vmem:[#allocation4 + $0x8] sm:$0xfe] %v1353_v53  ;;  %v4584_v18 = vsel %vm1351_vm10, %v1353_v53, %v1356_v23  ;;  %v4587_v19 = vsel %vm1351_vm10, %v1356_v23, %v1360_v12  ;;  %v4600_v35 = vrot.slane %v5260_v54, 6 }
 0x5eb   :  { %v4590_v20 = vsel %vm1351_vm10, %v1360_v12, %v1364_v52  ;;  %v4594_v26 = vsel %vm1351_vm10, %v1364_v52, %v1368_v45  ;;  %v4597_v27 = vsel %vm1351_vm10, %v1372_v13, %v1376_v32  ;;  %v1434_v42 = vmul.f32 %v5261_v37, %v1418_v17 }
 0x5ec   :  { %1417 = vst [vmem:[#allocation4 + $0x88] sm:$0x1] %v1380_v15  ;;  %v1504_v7 = vrot.slane %v4545_v49, 1  ;;  %v1509_v46 = vrot.slane %v4548_v50, 1  ;;  %v1507_v40 = vrot.slane %v4584_v18, 1  ;;  %v1511_v2 = vrot.slane %v4587_v19, 1 }
 0x5ed   :  { %v4608_v36 = vsel %vm1351_vm10, %v1368_v45, %v1372_v13  ;;  %v4611_v29 = vsel %vm1595_vm11, %v4565_v6, %v1601_v25  ;;  %v4614_v31 = vsel %vm1595_vm11, %v1601_v25, %v4565_v6  ;;  %v1778_v34 = vpack.c.bf16 %v4590_v20, %v4587_v19  ;;  %v3594_v45 = vld [vmem:[%s5223_s6 + $0x264] ss:$8 sps:$4 sm:$0xff]  }
 0x5ee   :  { %v1503_v59 = vrot.slane %v1466_v38, 1  ;;  %v1515_v60 = vrot.slane %v4590_v20, 1  ;;  %v4621_v61 = vsel %vm1595_vm11, %v4565_v6, %v4600_v35  ;;  %v1771_v63 = vpack.c.bf16 %v4545_v49, %v1434_v42 }
 0x5ef   :  { %v1510_v5 = vsel %vm1502_vm12, %v1504_v7, %v1509_v46  ;;  %v1519_v14 = vrot.slane %v4594_v26, 1  ;;  %v1777_v1 = vpack.c.bf16 %v4552_v28, %v4548_v50  ;;  %v1512_v43 = vsel %vm1502_vm12, %v1507_v40, %v1511_v2 }
 0x5f0   :  { %v1513_v56 = vrot.slane %v4552_v28, 1  ;;  %v1517_v57 = vrot.slane %v4556_v39, 1  ;;  %v4634_v0 = vsel %vm1351_vm10, %v4536_v41, %v4538_v44  ;;  %v1523_v62 = vrot.slane %v4608_v36, 1  ;;  %v3589_v44 = vld [vmem:[%s5223_s6 + $0x270] ss:$8 sps:$4 sm:$0xff]  }
 0x5f1   :  { %v1419_v21 = vld [vmem:[#allocation4 + $0x8] sm:$0xff]  ;;  %v1527_v9 = vrot.slane %v4597_v27, 1  ;;  %v1505_v4 = vsel %vm1502_vm12, %v1503_v59, %v1504_v7  ;;  %v1516_v10 = vsel %vm1502_vm12, %v1511_v2, %v1515_v60  ;;  %v4643_v11 = vmul.f32 %v5262_v8, %v4594_v26 }
 0x5f2   :  { %v1467_v55 = vld [vmem:[#allocation4 + $0x8] sm:$0xfe]  ;;  %v1435_v58 = vmul.f32 %v5261_v37, %v1419_v21  ;;  %v4646_v16 = vsel %vm1351_vm10, %v1376_v32, %v1380_v15  ;;  %v1520_v23 = vsel %vm1502_vm12, %v1515_v60, %v1519_v14  ;;  %v4656_v12 = vmul.f32 %v5262_v8, %v4556_v39 }
 0x5f3   :  { %v1506_v3 = vrot.slane %v1467_v55, 1  ;;  %v4662_v13 = vsel %vm1502_vm12, %v1509_v46, %v1513_v56  ;;  %v4665_v32 = vsel %vm1502_vm12, %v1513_v56, %v1517_v57  ;;  %v1521_v15 = vrot.slane %v4634_v0, 1  ;;  %v4675_v54 = vld [vmem:[#allocation4 + $0x88] sm:$0x1]  ;;  %v1569_v46 = vld [vmem:[#allocation4] sm:$0xfc] }
 0x5f4   :  { %v1772_v41 = vpack.c.bf16 %v4584_v18, %v1435_v58  ;;  %v4669_v17 = vsel %vm1502_vm12, %v1519_v14, %v1523_v62  ;;  %v4672_v22 = vsel %vm1502_vm12, %v1523_v62, %v1527_v9  ;;  %v1525_v25 = vrot.slane %v4561_v30, 1  ;;  %v1570_v59 = vld [vmem:[#allocation4 + $0x8] sm:$0xfc] }
 0x5f5   :  { %v1508_v53 = vsel %vm1502_vm12, %v1506_v3, %v1507_v40  ;;  %v4680_v37 = vsel %vm1351_vm10, %v4540_v47, %v4542_v48  ;;  %v1773_v42 = vpack.c.bf16 %v1510_v5, %v1505_v4  ;;  %v1780_v38 = vpack.c.bf16 %v1520_v23, %v1516_v10  ;;  %v3592_v40 = vld [vmem:[%s5223_s6 + $0x260] ss:$8 sps:$4 sm:$0xff]   ;;  %v3595_v4 = vld [vmem:[%s5223_s6 + $0x250] ss:$8 sps:$4 sm:$0xff]  }
 0x5f6   :  { %v1774_v52 = vpack.c.bf16 %v1512_v43, %v1508_v53  ;;  %2415 = vmatprep.mubr.bf16.mxu1 %v1772_v41  ;;  %v1784_v7 = vpack.c.bf16 %v4608_v36, %v4643_v11  ;;  %v1779_v2 = vpack.c.bf16 %v4665_v32, %v4662_v13  ;;  %v1783_v47 = vpack.c.bf16 %v4634_v0, %v4656_v12 }
 0x5f7   :  { %2416 = vmatmul.mubr.bf16.vlgmr.msra.gmra.mxu1 %v1771_v63  ;;  %v1531_v48 = vrot.slane %v4646_v16, 1  ;;  %v4694_v60 = vmul.f32 %v4565_v6, %v4587_v19  ;;  %v1786_v63 = vpack.c.bf16 %v4672_v22, %v4669_v17  ;;  %v1790_v5 = vpack.c.bf16 %v4646_v16, %v4597_v27 }
 0x5f8   :  { %2488 = vmatprep.mubr.bf16.mxu0 %v1774_v52  ;;  %2530 = vmatpush1.bf16.msra.mxu1 %v3589_v44  ;;  %v4704_v14 = vsel %vm1502_vm12, %v1517_v57, %v1521_v15  ;;  %v1535_v21 = vrot.slane %v4675_v54, 1  ;;  %v4710_v19 = vsel %vm1502_vm12, %v1521_v15, %v1525_v25  ;;  %v1620_v55 = vmul.f32 %v4565_v6, %v1569_v46  ;;  %v3603_v15 = vld [vmem:[%s5223_s6 + $0x234] ss:$8 sps:$4 sm:$0xff]  }
 0x5f9   :  { %2425 = vmatprep.mubr.bf16.mxu1 %v1778_v34  ;;  %2489 = vmatmul.mubr.bf16.vlgmr.msra.gmra.mxu0 %v1773_v42  ;;  %v3597_v34 = vld [vmem:[%s5223_s6 + $0x254] ss:$8 sps:$4 sm:$0xff]   ;;  %v1622_v43 = vmul.f32 %v4565_v6, %v4545_v49  ;;  %v1624_v56 = vmul.f32 %v4565_v6, %v4548_v50  ;;  %v4718_v58 = vmul.f32 %v4565_v6, %v1570_v59  ;;  %v1665_v57 = vrot.slane %v4694_v60, 2  ;;  %v3598_v50 = vld [vmem:[%s5223_s6 + $0x240] ss:$8 sps:$4 sm:$0xff]  }
 0x5fa   :  { %2531 = vmatprep.subr.bf16.mxu1 %v3594_v45  ;;  %2498 = vmatprep.mubr.bf16.mxu0 %v1780_v38  ;;  %v1627_v3 = vmul.f32 %v4611_v29, %v4590_v20  ;;  %v1629_v62 = vmul.f32 %v4614_v31, %v4594_v26  ;;  %v4731_v49 = vsel %vm1502_vm12, %v1527_v9, %v1531_v48  ;;  %v1657_v8 = vrot.slane %v1620_v55, 2  ;;  %v3600_v20 = vld [vmem:[%s5223_s6 + $0x244] ss:$8 sps:$4 sm:$0xff]   ;;  %v1585_v59 = vld [vmem:[#allocation4 + $0x80] sm:$0x3] }
 0x5fb   :  { %v4735_v10 = vmul.f32 %v4565_v6, %v4584_v18  ;;  %v1658_v11 = vrot.slane %v1622_v43, 2  ;;  %v1785_v26 = vpack.c.bf16 %v4710_v19, %v4704_v14  ;;  %v1663_v41 = vrot.slane %v1624_v56, 2  ;;  %v3601_v43 = vld [vmem:[%s5223_s6 + $0x230] ss:$8 sps:$4 sm:$0xff]   ;;  %v3615_v60 = vld [vmem:[%s5223_s6 + $0x2f4] ss:$8 sps:$4 sm:$0xff]  }
 0x5fc   :  { %2532 = vmatpush1.bf16.msra.mxu1 %v3592_v40  ;;  %v1669_v44 = vrot.slane %v1627_v3, 2  ;;  %v1673_v53 = vrot.slane %v1629_v62, 2  ;;  %v1626_v18 = vmul.f32 %v4611_v29, %v4552_v28  ;;  %v1628_v23 = vmul.f32 %v4614_v31, %v4556_v39  ;;  %v1586_v31 = vld [vmem:[#allocation4 + $0x88] sm:$0x3] }
 0x5fd   :  { %2533 = vmatprep.subr.bf16.mxu1 %v3597_v34  ;;  %v4743_v9 = vsel %vm1656_vm13, %v1657_v8, %v1658_v11  ;;  %v1631_v52 = vmul.f32 %v4565_v6, %v4608_v36  ;;  %v4755_v45 = vsel %vm1656_vm13, %v1658_v11, %v1663_v41  ;;  %v1633_v39 = vmul.f32 %v4565_v6, %v4597_v27  ;;  %v3606_v11 = vld [vmem:[%s5223_s6 + $0x224] ss:$8 sps:$4 sm:$0xff]   ;;  %v3607_v14 = vld [vmem:[%s5223_s6 + $0x210] ss:$8 sps:$4 sm:$0xff]  }
 0x5fe   :  { %v4760_v13 = vsel %vm1656_vm13, %v1665_v57, %v1669_v44  ;;  %v4763_v29 = vsel %vm1656_vm13, %v1669_v44, %v1673_v53  ;;  %v1775_v28 = vpack.c.bf16 %v4755_v45, %v4743_v9  ;;  %v1671_v32 = vrot.slane %v1628_v23, 2  ;;  %v2661_v9 = vld [vmem:[%s5227_s10 + $0xf8] sm:$0xff] }
 0x5ff   :  { %2426 = vmatmul.mubr.bf16.gmra.mxu1 %v1777_v1  ;;  %v1782_v36 = vpack.c.bf16 %v4763_v29, %v4760_v13  ;;  %v1667_v1 = vrot.slane %v1626_v18, 2  ;;  %v1677_v17 = vrot.slane %v1631_v52, 2  ;;  %v1681_v22 = vrot.slane %v1633_v39, 2  ;;  %3358 = vmatprep.subr.mxu0 %v2661_v9  ;;  %v2645_v45 = vld [vmem:[%s5227_s10 + $0x78] sm:$0xff]  ;;  %v2660_v13 = vld [vmem:[%s5227_s10 + $0xf0] sm:$0xff] }
 0x600   :  { %2534 = vmatpush1.bf16.msra.mxu1 %v3595_v4  ;;  %2435 = vmatprep.mubr.bf16.mxu1 %v1784_v7  ;;  %v1630_v42 = vmul.f32 %v4565_v6, %v4634_v0  ;;  %v1632_v38 = vmul.f32 %v4565_v6, %v4561_v30  ;;  %v1635_v40 = vmul.f32 %v4621_v61, %v4646_v16  ;;  %v1660_v18 = vrot.slane %v4718_v58, 2  ;;  %v3604_v0 = vld [vmem:[%s5223_s6 + $0x220] ss:$8 sps:$4 sm:$0xff]   ;;  %v2644_v29 = vld [vmem:[%s5227_s10 + $0x70] sm:$0xff] }
 0x601   :  { %2499 = vmatmul.mubr.bf16.gmra.mxu0 %v1779_v2  ;;  %2535 = vmatprep.subr.bf16.mxu1 %v3600_v20  ;;  %v4782_v7 = vsel %vm1656_vm13, %v1663_v41, %v1667_v1  ;;  %v4785_v46 = vsel %vm1656_vm13, %v1667_v1, %v1671_v32  ;;  %v1637_v2 = vmul.f32 %v4600_v35, %v1586_v31  ;;  %v1482_v20 = vld [vmem:[#allocation4 + $0x80] sm:$0x1]  ;;  %v1661_v39 = vrot.slane %v4735_v10, 2 }
 0x602   :  { %2508 = vmatprep.mubr.bf16.mxu0 %v1786_v63  ;;  %v1781_v34 = vpack.c.bf16 %v4785_v46, %v4782_v7  ;;  %v4793_v55 = vsel %vm1656_vm13, %v1673_v53, %v1677_v17  ;;  %v4796_v6 = vsel %vm1656_vm13, %v1677_v17, %v1681_v22  ;;  %v1675_v63 = vrot.slane %v1630_v42, 2  ;;  %v3621_v17 = vld [vmem:[%s5223_s6 + $0x2d4] ss:$8 sps:$4 sm:$0xff]   ;;  %v3624_v42 = vld [vmem:[%s5223_s6 + $0x2c4] ss:$8 sps:$4 sm:$0xff]   ;;  %3359 = vmatpush3.msra.mxu0 %v2645_v45 }
 0x603   :  { %v1788_v56 = vpack.c.bf16 %v4796_v6, %v4793_v55  ;;  %v1679_v3 = vrot.slane %v1632_v38, 2  ;;  %v1685_v62 = vrot.slane %v1635_v40, 2  ;;  %v1689_v4 = vrot.slane %v1637_v2, 2  ;;  %v3622_v38 = vld [vmem:[%s5223_s6 + $0x2c0] ss:$8 sps:$4 sm:$0xff]   ;;  %3360 = vmatprep.subr.mxu0 %v2660_v13  ;;  %v2641_v55 = vld [vmem:[%s5227_s10 + $0x58] sm:$0xff] }
 0x604   :  { %2536 = vmatpush1.bf16.msra.mxu1 %v3598_v50  ;;  %v1536_v8 = vsel %vm1502_vm12, %v1531_v48, %v1535_v21  ;;  %v4812_v41 = vsel %vm1656_vm13, %v1671_v32, %v1675_v63  ;;  %v1634_v44 = vmul.f32 %v4621_v61, %v4680_v37  ;;  %v1636_v53 = vmul.f32 %v4600_v35, %v1585_v59  ;;  %v3612_v50 = vld [vmem:[%s5223_s6 + $0x204] ss:$8 sps:$4 sm:$0xff]   ;;  %v3627_v40 = vld [vmem:[%s5223_s6 + $0x2b4] ss:$8 sps:$4 sm:$0xff]   ;;  %v3625_v2 = vld [vmem:[%s5223_s6 + $0x2b0] ss:$8 sps:$4 sm:$0xff]  }
 0x605   :  { %2537 = vmatprep.subr.bf16.mxu1 %v3603_v15  ;;  %v4819_v54 = vsel %vm1656_vm13, %v1675_v63, %v1679_v3  ;;  %v4822_v48 = vsel %vm1656_vm13, %v1681_v22, %v1685_v62  ;;  %v4825_v21 = vsel %vm1656_vm13, %v1685_v62, %v1689_v4  ;;  %v1792_v52 = vpack.c.bf16 %v1536_v8, %v4731_v49  ;;  %v3619_v22 = vld [vmem:[%s5223_s6 + $0x2d0] ss:$8 sps:$4 sm:$0xff]   ;;  %v3630_v59 = vld [vmem:[%s5223_s6 + $0x2a4] ss:$8 sps:$4 sm:$0xff]   ;;  %v3628_v63 = vld [vmem:[%s5223_s6 + $0x2a0] ss:$8 sps:$4 sm:$0xff]  }
 0x606   :  { %v1787_v61 = vpack.c.bf16 %v4819_v54, %v4812_v41  ;;  %v1794_v35 = vpack.c.bf16 %v4825_v21, %v4822_v48  ;;  %v1683_v58 = vrot.slane %v1634_v44, 2  ;;  %v1687_v23 = vrot.slane %v1636_v53, 2  ;;  %v3636_v62 = vld [vmem:[%s5223_s6 + $0x284] ss:$8 sps:$4 sm:$0xff]   ;;  %v3634_v4 = vld [vmem:[%s5223_s6 + $0x280] ss:$8 sps:$4 sm:$0xff]   ;;  %3361 = vmatpush3.msra.mxu0 %v2644_v29 }
 0x607   :  { %2436 = vmatmul.mubr.bf16.gmra.mxu1 %v1783_v47  ;;  %v1533_v12 = vrot.slane %v1482_v20, 1  ;;  %v3609_v47 = vld [vmem:[%s5223_s6 + $0x214] ss:$8 sps:$4 sm:$0xff]   ;;  %v1662_v31 = vsel %vm1656_vm13, %v1660_v18, %v1661_v39  ;;  %v1789_v10 = vpack.c.bf16 %v4680_v37, %v4561_v30  ;;  %v3613_v30 = vld [vmem:[%s5223_s6 + $0x2f0] ss:$8 sps:$4 sm:$0xff]   ;;  %v2658_v7 = vld [vmem:[%s5227_s10 + $0xe0] sm:$0xff] }
 0x608   :  { %2538 = vmatpush1.bf16.msra.mxu1 %v3601_v43  ;;  %2445 = vmatprep.mubr.bf16.mxu1 %v1790_v5  ;;  %v1684_v27 = vsel %vm1656_vm13, %v1679_v3, %v1683_v58  ;;  %v1688_v16 = vsel %vm1656_vm13, %v1683_v58, %v1687_v23  ;;  %v1529_v5 = vrot.slane %v4680_v37, 1  ;;  %v3610_v37 = vld [vmem:[%s5223_s6 + $0x200] ss:$8 sps:$4 sm:$0xff]   ;;  %v3633_v43 = vld [vmem:[%s5223_s6 + $0x294] ss:$8 sps:$4 sm:$0xff]  }
 0x609   :  { %2509 = vmatmul.mubr.bf16.gmra.mxu0 %v1785_v26  ;;  %2539 = vmatprep.subr.bf16.mxu1 %v3606_v11  ;;  %v1793_v49 = vpack.c.bf16 %v1688_v16, %v1684_v27  ;;  %v1666_v26 = vsel %vm1656_vm13, %v1661_v39, %v1665_v57  ;;  %v3616_v57 = vld [vmem:[%s5223_s6 + $0x2e0] ss:$8 sps:$4 sm:$0xff]   ;;  %v3631_v3 = vld [vmem:[%s5223_s6 + $0x290] ss:$8 sps:$4 sm:$0xff]  }
 0x60a   :  { %2518 = vmatprep.mubr.bf16.mxu0 %v1792_v52  ;;  %v1534_v19 = vsel %vm1502_vm12, %v1529_v5, %v1533_v12  ;;  %v1776_v1 = vpack.c.bf16 %v1666_v26, %v1662_v31  ;;  %v1530_v32 = vsel %vm1502_vm12, %v1525_v25, %v1529_v5  ;;  %v3618_v25 = vld [vmem:[%s5223_s6 + $0x2e4] ss:$8 sps:$4 sm:$0xff]   ;;  %v2656_v6 = vld [vmem:[%s5227_s10 + $0xd0] sm:$0xff]  ;;  %v2653_v44 = vld [vmem:[%s5227_s10 + $0xb8] sm:$0xff] }
 0x60b   :  { %v1791_v15 = vpack.c.bf16 %v1534_v19, %v1530_v32  ;;  %v2642_v46 = vld [vmem:[%s5227_s10 + $0x60] sm:$0xff]  ;;  %v2655_v8 = vld [vmem:[%s5227_s10 + $0xc8] sm:$0xff]  ;;  %v2637_v53 = vld [vmem:[%s5227_s10 + $0x38] sm:$0xff] }
 0x60c   :  { %2540 = vmatpush1.bf16.msra.mxu1 %v3604_v0  ;;  %v2639_v11 = vld [vmem:[%s5227_s10 + $0x48] sm:$0xff]  ;;  %v2654_v20 = vld [vmem:[%s5227_s10 + $0xc0] sm:$0xff]  ;;  %v2652_v18 = vld [vmem:[%s5227_s10 + $0xb0] sm:$0xff] }
 0x60d   :  { %2541 = vmatprep.subr.bf16.mxu1 %v3609_v47  ;;  %v2638_v41 = vld [vmem:[%s5227_s10 + $0x40] sm:$0xff]  ;;  %v2636_v54 = vld [vmem:[%s5227_s10 + $0x30] sm:$0xff]  ;;  %v2651_v48 = vld [vmem:[%s5227_s10 + $0xa8] sm:$0xff] }
 0x60e   :  { %v2635_v21 = vld [vmem:[%s5227_s10 + $0x28] sm:$0xff]  ;;  %v2649_v58 = vld [vmem:[%s5227_s10 + $0x98] sm:$0xff]  ;;  %v2648_v52 = vld [vmem:[%s5227_s10 + $0x90] sm:$0xff] }
 0x60f   :  { %2446 = vmatmul.mubr.bf16.gmra.mxu1 %v1789_v10  ;;  %v2633_v23 = vld [vmem:[%s5227_s10 + $0x18] sm:$0xff]  ;;  %v2632_v0 = vld [vmem:[%s5227_s10 + $0x10] sm:$0xff]  ;;  %v2647_v12 = vld [vmem:[%s5227_s10 + $0x88] sm:$0xff] }
 0x610   :  { %2542 = vmatpush1.bf16.msra.mxu1 %v3607_v14  ;;  %2561 = vmatprep.mubr.bf16.mxu1 %v1776_v1  ;;  %v2631_v47 = vld [vmem:[%s5227_s10 + $0x8] sm:$0xff]  ;;  %v2646_v39 = vld [vmem:[%s5227_s10 + $0x80] sm:$0xff] }
 0x611   :  { %2519 = vmatmul.mubr.bf16.gmra.mxu0 %v1791_v15  ;;  %2543 = vmatprep.subr.bf16.mxu1 %v3612_v50  ;;  %v2630_v27 = vld [vmem:[%s5227_s10] sm:$0xff] }
 0x614   :  { %2544 = vmatpush1.bf16.msra.mxu1 %v3610_v37 }
 0x615   :  { %2545 = vmatprep.subr.bf16.mxu1 %v3615_v60 }
 0x618   :  { %2546 = vmatpush2.bf16.msra.mxu1 %v3613_v30 }
 0x619   :  { %2547 = vmatprep.subr.bf16.mxu1 %v3618_v25 }
 0x61c   :  { %2548 = vmatpush2.bf16.msra.mxu1 %v3616_v57 }
 0x61d   :  { %2549 = vmatprep.subr.bf16.mxu1 %v3621_v17 }
 0x620   :  { %2550 = vmatpush2.bf16.msra.mxu1 %v3619_v22 }
 0x621   :  { %2551 = vmatprep.subr.bf16.mxu1 %v3624_v42 }
 0x624   :  { %2552 = vmatpush2.bf16.msra.mxu1 %v3622_v38 }
 0x625   :  { %2553 = vmatprep.subr.bf16.mxu1 %v3627_v40 }
 0x628   :  { %2554 = vmatpush2.bf16.msra.mxu1 %v3625_v2 }
 0x629   :  { %2555 = vmatprep.subr.bf16.mxu1 %v3630_v59 }
 0x62c   :  { %2556 = vmatpush2.bf16.msra.mxu1 %v3628_v63 }
 0x62d   :  { %2557 = vmatprep.subr.bf16.mxu1 %v3633_v43 }
 0x630   :  { %2558 = vmatpush2.bf16.msra.mxu1 %v3631_v3 }
 0x631   :  { %2559 = vmatprep.subr.bf16.mxu1 %v3636_v62 }
 0x634   :  { %2560 = vmatpush2.bf16.msra.mxu1 %v3634_v4  ;;  %v1891_v4 = vld [vmem:[#allocation10] sm:$0x3] }
 0x635   :  { %3393 = vmatprep.subr.mxu1 %v2661_v9 }
 0x637   :  { %2562 = vmatmul.mubr.bf16.vlgmr.msra.gmra.mxu1 %v1775_v28  ;;  %v2659_v28 = vld [vmem:[%s5227_s10 + $0xe8] sm:$0xff] }
 0x638   :  { %2571 = vmatprep.mubr.bf16.mxu1 %v1782_v36  ;;  %3394 = vmatpush3.msra.mxu1 %v2645_v45  ;;  %v2643_v36 = vld [vmem:[%s5227_s10 + $0x68] sm:$0xff] }
 0x639   :  { %3395 = vmatprep.subr.mxu1 %v2660_v13  ;;  %3362 = vmatprep.subr.mxu0 %v2659_v28 }
 0x63a   :  { %3396 = vmatpush3.msra.mxu1 %v2644_v29  ;;  %3363 = vmatpush3.msra.mxu0 %v2643_v36  ;;  %v1896_v29 = vrot.slane %v1891_v4, %v4144_v33 }
 0x63b   :  { %3397 = vmatprep.subr.mxu1 %v2659_v28  ;;  %3364 = vmatprep.subr.mxu0 %v2658_v7  ;;  %v1900_v28 = vrot.slane %v1891_v4, %v5258_v24 }
 0x63c   :  { %3398 = vmatpush3.msra.mxu1 %v2643_v36  ;;  %3365 = vmatpush3.msra.mxu0 %v2642_v46 }
 0x63d   :  { %3399 = vmatprep.subr.mxu1 %v2658_v7 }
 0x63e   :  { %3400 = vmatpush3.msra.mxu1 %v2642_v46 }
 0x63f   :  { %2572 = vmatmul.mubr.bf16.gmra.mxu1 %v1781_v34  ;;  %v2657_v34 = vld [vmem:[%s5227_s10 + $0xd8] sm:$0xff] }
 0x640   :  { %2581 = vmatprep.mubr.bf16.mxu1 %v1788_v56  ;;  %3366 = vmatprep.subr.mxu0 %v2657_v34  ;;  %v2640_v56 = vld [vmem:[%s5227_s10 + $0x50] sm:$0xff] }
 0x641   :  { %3401 = vmatprep.subr.mxu1 %v2657_v34  ;;  %3367 = vmatpush3.msra.mxu0 %v2641_v55 }
 0x642   :  { %3402 = vmatpush3.msra.mxu1 %v2641_v55  ;;  %3368 = vmatprep.subr.mxu0 %v2656_v6 }
 0x643   :  { %3403 = vmatprep.subr.mxu1 %v2656_v6  ;;  %3369 = vmatpush3.msra.mxu0 %v2640_v56 }
 0x644   :  { %3404 = vmatpush3.msra.mxu1 %v2640_v56  ;;  %3370 = vmatprep.subr.mxu0 %v2655_v8 }
 0x645   :  { %3405 = vmatprep.subr.mxu1 %v2655_v8  ;;  %3371 = vmatpush3.msra.mxu0 %v2639_v11 }
 0x646   :  { %3406 = vmatpush3.msra.mxu1 %v2639_v11  ;;  %3372 = vmatprep.subr.mxu0 %v2654_v20 }
 0x647   :  { %2582 = vmatmul.mubr.bf16.gmra.mxu1 %v1787_v61  ;;  %3407 = vmatprep.subr.mxu1 %v2654_v20  ;;  %v2650_v61 = vld [vmem:[%s5227_s10 + $0xa0] sm:$0xff] }
 0x648   :  { %2591 = vmatprep.mubr.bf16.mxu1 %v1794_v35  ;;  %3373 = vmatpush3.msra.mxu0 %v2638_v41  ;;  %v2634_v35 = vld [vmem:[%s5227_s10 + $0x20] sm:$0xff] }
 0x649   :  { %3408 = vmatpush3.msra.mxu1 %v2638_v41  ;;  %3374 = vmatprep.subr.mxu0 %v2653_v44 }
 0x64a   :  { %3409 = vmatprep.subr.mxu1 %v2653_v44  ;;  %3375 = vmatpush3.msra.mxu0 %v2637_v53 }
 0x64b   :  { %3410 = vmatpush3.msra.mxu1 %v2637_v53  ;;  %3376 = vmatprep.subr.mxu0 %v2652_v18 }
 0x64c   :  { %3411 = vmatprep.subr.mxu1 %v2652_v18  ;;  %3377 = vmatpush3.msra.mxu0 %v2636_v54 }
 0x64d   :  { %3412 = vmatpush3.msra.mxu1 %v2636_v54  ;;  %3378 = vmatprep.subr.mxu0 %v2651_v48 }
 0x64e   :  { %3413 = vmatprep.subr.mxu1 %v2651_v48  ;;  %3379 = vmatpush3.msra.mxu0 %v2635_v21 }
 0x64f   :  { %2592 = vmatmul.mubr.bf16.gmra.mxu1 %v1793_v49  ;;  %3380 = vmatprep.subr.mxu0 %v2650_v61 }
 0x650   :  { %3414 = vmatpush3.msra.mxu1 %v2635_v21  ;;  %3381 = vmatpush3.msra.mxu0 %v2634_v35 }
 0x651   :  { %3415 = vmatprep.subr.mxu1 %v2650_v61  ;;  %3382 = vmatprep.subr.mxu0 %v2649_v58 }
 0x652   :  { %3416 = vmatpush3.msra.mxu1 %v2634_v35  ;;  %3383 = vmatpush3.msra.mxu0 %v2633_v23 }
 0x653   :  { %3417 = vmatprep.subr.mxu1 %v2649_v58  ;;  %3384 = vmatprep.subr.mxu0 %v2648_v52 }
 0x654   :  { %3418 = vmatpush3.msra.mxu1 %v2633_v23  ;;  %3385 = vmatpush3.msra.mxu0 %v2632_v0 }
 0x655   :  { %3419 = vmatprep.subr.mxu1 %v2648_v52  ;;  %3386 = vmatprep.subr.mxu0 %v2647_v12 }
 0x656   :  { %3420 = vmatpush3.msra.mxu1 %v2632_v0  ;;  %3387 = vmatpush3.msra.mxu0 %v2631_v47 }
 0x657   :  { %3421 = vmatprep.subr.mxu1 %v2647_v12  ;;  %3388 = vmatprep.subr.mxu0 %v2646_v39 }
 0x658   :  { %3422 = vmatpush3.msra.mxu1 %v2631_v47  ;;  %3389 = vmatpush3.msra.mxu0 %v2630_v27 }
 0x659   :  { %3423 = vmatprep.subr.mxu1 %v2646_v39 }
 0x65a   :  { %3424 = vmatpush3.msra.mxu1 %v2630_v27 }
 0x6b7   :  { %v2417_v16 = vpop.f32.mrf.mxu1 }
 0x6b8   :  { %v2418_v55 = vadd.f32 %v2417_v16, %v1896_v29 }
 0x6b9   :  { %v2419_v5 = vpop.f32.mrf.mxu1  ;;  %v2490_v26 = vpop.f32.mrf.mxu0 }
 0x6ba   :  { %v2420_v8 = vadd.f32 %v2419_v5, %v1900_v28  ;;  %v2491_v21 = vadd.f32 %v2490_v26, %v2418_v55 }
 0x6bb   :  { %v2421_v49 = vpop.f32.mrf.mxu1  ;;  %v2492_v1 = vpop.f32.mrf.mxu0 }
 0x6bc   :  { %v2422_v7 = vadd.f32 %v2421_v49, %v1896_v29  ;;  %v2493_v23 = vadd.f32 %v2492_v1, %v2420_v8 }
 0x6bd   :  { %v2423_v31 = vpop.f32.mrf.mxu1  ;;  %v2494_v15 = vpop.f32.mrf.mxu0 }
 0x6be   :  { %v2424_v6 = vadd.f32 %v2423_v31, %v1900_v28  ;;  %v2495_v41 = vadd.f32 %v2494_v15, %v2422_v7 }
 0x6bf   :  { %v2427_v14 = vpop.f32.mrf.mxu1  ;;  %v2496_v60 = vpop.f32.mrf.mxu0 }
 0x6c0   :  { %v2428_v56 = vadd.f32 %v2427_v14, %v1896_v29  ;;  %v2497_v61 = vadd.f32 %v2496_v60, %v2424_v6 }
 0x6c1   :  { %v2429_v19 = vpop.f32.mrf.mxu1  ;;  %v2500_v25 = vpop.f32.mrf.mxu0 }
 0x6c2   :  { %v2430_v11 = vadd.f32 %v2429_v19, %v1900_v28  ;;  %v2501_v35 = vadd.f32 %v2500_v25, %v2428_v56 }
 0x6c3   :  { %v2431_v10 = vpop.f32.mrf.mxu1  ;;  %v2502_v17 = vpop.f32.mrf.mxu0 }
 0x6c4   :  { %v2432_v44 = vadd.f32 %v2431_v10, %v1896_v29  ;;  %v2503_v52 = vadd.f32 %v2502_v17, %v2430_v11 }
 0x6c5   :  { %v2433_v50 = vpop.f32.mrf.mxu1  ;;  %v2504_v42 = vpop.f32.mrf.mxu0 }
 0x6c6   :  { %v2434_v53 = vadd.f32 %v2433_v50, %v1900_v28  ;;  %v2505_v39 = vadd.f32 %v2504_v42, %v2432_v44 }
 0x6c7   :  { %v2437_v32 = vpop.f32.mrf.mxu1  ;;  %v2506_v40 = vpop.f32.mrf.mxu0 }
 0x6c8   :  { %v2438_v18 = vadd.f32 %v2437_v32, %v1896_v29  ;;  %v2507_v49 = vadd.f32 %v2506_v40, %v2434_v53 }
 0x6c9   :  { %v2439_v37 = vpop.f32.mrf.mxu1  ;;  %v2510_v59 = vpop.f32.mrf.mxu0 }
 0x6ca   :  { %v2440_v0 = vadd.f32 %v2439_v37, %v1900_v28  ;;  %v2511_v31 = vadd.f32 %v2510_v59, %v2438_v18 }
 0x6cb   :  { %v2441_v30 = vpop.f32.mrf.mxu1  ;;  %v2512_v3 = vpop.f32.mrf.mxu0 }
 0x6cc   :  { %v2442_v12 = vadd.f32 %v2441_v30, %v1896_v29  ;;  %v2513_v37 = vadd.f32 %v2512_v3, %v2440_v0 }
 0x6cd   :  { %v2443_v57 = vpop.f32.mrf.mxu1  ;;  %v2514_v45 = vpop.f32.mrf.mxu0 }
 0x6ce   :  { %v2444_v14 = vadd.f32 %v2443_v57, %v1900_v28  ;;  %v2515_v60 = vadd.f32 %v2514_v45, %v2442_v12 }
 0x6cf   :  { %v2447_v22 = vpop.f32.mrf.mxu1  ;;  %v2516_v46 = vpop.f32.mrf.mxu0 }
 0x6d0   :  { %v2448_v19 = vadd.f32 %v2447_v22, %v1896_v29  ;;  %v2517_v40 = vadd.f32 %v2516_v46, %v2444_v14 }
 0x6d1   :  { %v2449_v38 = vpop.f32.mrf.mxu1  ;;  %v2520_v54 = vpop.f32.mrf.mxu0 }
 0x6d2   :  { %v2450_v30 = vadd.f32 %v2449_v38, %v1900_v28  ;;  %v2521_v59 = vadd.f32 %v2520_v54, %v2448_v19 }
 0x6d3   :  { %v2451_v2 = vpop.f32.mrf.mxu1  ;;  %v2522_v10 = vpop.f32.mrf.mxu0 }
 0x6d5   :  { %v5032_v63 = vpop.f32.mrf.mxu1 }
 0x6f7   :  { %v2563_v43 = vpop.f32.mrf.mxu1 }
 0x6f8   :  { %v5038_v27 = vadd.f32 %v2563_v43, %v2491_v21  ;;  %v2452_v43 = vadd.f32 %v2451_v2, %v1896_v29 }
 0x6f9   :  { %v2565_v62 = vpop.f32.mrf.mxu1 }
 0x6fa   :  { %v5044_v50 = vadd.f32 %v2565_v62, %v2493_v23  ;;  %v2524_v62 = vpop.f32.mrf.mxu0 }
 0x6fb   :  { %v2567_v9 = vpop.f32.mrf.mxu1  ;;  %v2525_v56 = vadd.f32 %v2524_v62, %v2452_v43 }
 0x6fc   :  { %v5036_v58 = vadd.f32 %v2567_v9, %v2495_v41  ;;  %v2526_v29 = vpop.f32.mrf.mxu0 }
 0x6fd   :  { %v2569_v13 = vpop.f32.mrf.mxu1 }
 0x6fe   :  { %v5040_v16 = vadd.f32 %v2569_v13, %v2497_v61  ;;  %v2604_v1 = vadd.f32 %v5036_v58, %v5038_v27  ;;  %v2523_v13 = vadd.f32 %v2522_v10, %v2450_v30 }
 0x6ff   :  { %v2573_v36 = vpop.f32.mrf.mxu1 }
 0x700   :  { %v5042_v5 = vadd.f32 %v2573_v36, %v2501_v35  ;;  %v2617_v17 = vadd.f32 %v5040_v16, %v5044_v50  ;;  %v2454_v36 = vadd.f32 %v5032_v63, %v1900_v28 }
 0x701   :  { %v2575_v34 = vpop.f32.mrf.mxu1 }
 0x702   :  { %v5048_v32 = vadd.f32 %v2575_v34, %v2503_v52  ;;  %v2605_v57 = vadd.f32 %v2604_v1, %v5042_v5  ;;  %v2527_v63 = vadd.f32 %v2526_v29, %v2454_v36  ;;  %v2733_v1 = vld [vmem:[#allocation14] sm:$0xff] }
 0x703   :  { %v2577_v20 = vpop.f32.mrf.mxu1 }
 0x704   :  { %v5050_v15 = vadd.f32 %v2577_v20, %v2505_v39  ;;  %v2618_v9 = vadd.f32 %v2617_v17, %v5048_v32 }
 0x705   :  { %v2579_v48 = vpop.f32.mrf.mxu1 }
 0x706   :  { %v5055_v22 = vadd.f32 %v2579_v48, %v2507_v49  ;;  %v2606_v3 = vadd.f32 %v2605_v57, %v5050_v15 }
 0x707   :  { %v2583_v47 = vpop.f32.mrf.mxu1 }
 0x708   :  { %v5057_v42 = vadd.f32 %v2583_v47, %v2511_v31  ;;  %v2619_v34 = vadd.f32 %v2618_v9, %v5055_v22 }
 0x709   :  { %v2585_v26 = vpop.f32.mrf.mxu1 }
 0x70a   :  { %v5061_v38 = vadd.f32 %v2585_v26, %v2513_v37  ;;  %v2607_v46 = vadd.f32 %v2606_v3, %v5057_v42  ;;  %v2734_v26 = vld [vmem:[#allocation14 + $0x8] sm:$0xff] }
 0x70b   :  { %v2587_v25 = vpop.f32.mrf.mxu1  ;;  %2768 = vmatprep.subr.mxu0 %v2734_v26 }
 0x70c   :  { %v5063_v45 = vadd.f32 %v2587_v25, %v2515_v60  ;;  %v2620_v8 = vadd.f32 %v2619_v34, %v5061_v38 }
 0x70d   :  { %v2589_v4 = vpop.f32.mrf.mxu1 }
 0x70e   :  { %v5068_v55 = vadd.f32 %v2589_v4, %v2517_v40  ;;  %v2608_v11 = vadd.f32 %v2607_v46, %v5063_v45 }
 0x70f   :  { %v2593_v7 = vpop.f32.mrf.mxu1 }
 0x710   :  { %v5070_v2 = vadd.f32 %v2593_v7, %v2521_v59  ;;  %v2621_v28 = vadd.f32 %v2620_v8, %v5068_v55 }
 0x711   :  { %v2595_v6 = vpop.f32.mrf.mxu1 }
 0x712   :  { %v5074_v20 = vadd.f32 %v2595_v6, %v2523_v13  ;;  %v2609_v44 = vadd.f32 %v2608_v11, %v5070_v2 }
 0x713   :  { %v2597_v41 = vpop.f32.mrf.mxu1 }
 0x714   :  { %v5078_v53 = vadd.f32 %v2597_v41, %v2525_v56  ;;  %v2622_v54 = vadd.f32 %v2621_v28, %v5074_v20 }
 0x715   :  { %v2599_v18 = vpop.f32.mrf.mxu1 }
 0x716   :  { %v2610_v48 = vadd.f32 %v2609_v44, %v5078_v53  ;;  %v2600_v21 = vadd.f32 %v2599_v18, %v2527_v63 }
 0x718   :  { %v2611_v61 = vrot.slane %v2610_v48, 4  ;;  %v2623_v35 = vadd.f32 %v2622_v54, %v2600_v21 }
 0x71a   :  { %v2612_v23 = vadd.f32 %v2611_v61, %v2610_v48  ;;  %v2624_v52 = vrot.slane %v2623_v35, 4 }
 0x71c   :  { %v2613_v0 = vrot.slane %v2612_v23, 2  ;;  %v2625_v12 = vadd.f32 %v2624_v52, %v2623_v35 }
 0x71e   :  { %v2614_v47 = vadd.f32 %v2613_v0, %v2612_v23  ;;  %v2626_v39 = vrot.slane %v2625_v12, 2 }
 0x720   :  { %v2627_v49 = vadd.f32 %v2626_v39, %v2625_v12  ;;  %v2615_v31 = vrot.slane %v2614_v47, 1 }
 0x722   :  { %v2628_v14 = vrot.slane %v2627_v49, 1  ;;  %v2616_v10 = vadd.f32 %v2615_v31, %v2614_v47 }
 0x724   :  { %v2629_v19 = vadd.f32 %v2628_v14, %v2627_v49 }
 0x726   :  { %2726 = vmatprep.mubr.f32.mxu0 %v2629_v19 }
 0x727   :  { %2727 = vmatmul.mubr.f32.vlgmr.msra.gmra.mxu0 %v2616_v10 }
 0x728   :  { %2802 = vmatprep.mubr.f32.mxu0 %v5253_v51  ;;  %2769 = vmatpush1.msra.mxu0 %v2733_v1 }
 0x729   :  { %2981 = vmatprep.subr.mxu0 %v2734_v26 }
 0x7e7   :  { %v3390_v37 = vpop.f32.mrf.mxu0 }
 0x7e9   :  { %v3391_v60 = vpop.f32.mrf.mxu0 }
 0x7ea   :  { %v3392_v30 = vadd.f32 %v3391_v60, %v3390_v37 }
 0x7ec   :  { %v2732_v25 = vmul.f32 0.00048828125, %v3392_v30 }
 0x7ee   :  { %3280 = vmatmul.mubr.msk.f32.vlgmr.msra.gmra.mxu0 %vm944_vm9, %v2732_v25 }
 0x7ef   :  { %2982 = vmatpush1.msra.mxu0 %v2733_v1  ;;  %3015 = vmatprep.mubr.f32.mxu0 %v5253_v51 }
 0x8ae   :  { %v2804_v17 = vpop.f32.mrf.mxu0 }
 0x8af   :  { %v2812_v57 = vrot.slane %v2804_v17, %v4144_v33 }
 0x8b0   :  { %v2806_v40 = vpop.f32.mrf.mxu0 }
 0x8b1   :  { %v2816_v59 = vrot.slane %v2806_v40, %v4144_v33  ;;  %v5088_v43 = vsub.f32 %v5038_v27, %v2812_v57  ;;  %v5091_v62 = vsub.f32 %v5036_v58, %v2812_v57  ;;  %v5110_v58 = vsub.f32 %v5042_v5, %v2812_v57 }
 0x8b2   :  { %v2825_v5 = vsub.f32 %v5057_v42, %v2812_v57  ;;  %v2827_v56 = vsub.f32 %v5063_v45, %v2812_v57  ;;  %v2829_v63 = vsub.f32 %v5070_v2, %v2812_v57  ;;  %v2831_v48 = vsub.f32 %v5078_v53, %v2812_v57 }
 0x8b3   :  { %v5094_v4 = vsub.f32 %v5044_v50, %v2816_v59  ;;  %v5097_v9 = vsub.f32 %v5040_v16, %v2816_v59  ;;  %v5100_v51 = vsub.f32 %v5048_v32, %v2816_v59  ;;  %v5103_v3 = vsub.f32 %v5055_v22, %v2816_v59 }
 0x8b4   :  { %v5113_v50 = vsub.f32 %v5061_v38, %v2816_v59  ;;  %v5116_v16 = vsub.f32 %v5050_v15, %v2812_v57  ;;  %v2833_v36 = vmul.f32 %v5088_v43, %v5088_v43  ;;  %v2835_v7 = vmul.f32 %v5091_v62, %v5091_v62 }
 0x8b5   :  { %v2834_v13 = vmul.f32 %v5094_v4, %v5094_v4  ;;  %v2836_v27 = vmul.f32 %v5097_v9, %v5097_v9  ;;  %v2838_v32 = vmul.f32 %v5100_v51, %v5100_v51  ;;  %v5125_v34 = vsub.f32 %v5068_v55, %v2816_v59 }
 0x8b6   :  { %v2840_v38 = vmul.f32 %v5103_v3, %v5103_v3  ;;  %v2837_v46 = vmul.f32 %v5110_v58, %v5110_v58  ;;  %v2849_v29 = vadd.f32 %v2835_v7, %v2833_v36  ;;  %v5133_v6 = vsub.f32 %v5074_v20, %v2816_v59 }
 0x8b7   :  { %v2862_v22 = vadd.f32 %v2836_v27, %v2834_v13  ;;  %v2842_v8 = vmul.f32 %v5113_v50, %v5113_v50  ;;  %v2839_v42 = vmul.f32 %v5116_v16, %v5116_v16  ;;  %v5140_v41 = vsub.f32 %v2600_v21, %v2816_v59 }
 0x8b8   :  { %v2850_v11 = vadd.f32 %v2849_v29, %v2837_v46  ;;  %v2844_v28 = vmul.f32 %v5125_v34, %v5125_v34  ;;  %v2841_v20 = vmul.f32 %v2825_v5, %v2825_v5  ;;  %v2846_v45 = vmul.f32 %v5133_v6, %v5133_v6 }
 0x8b9   :  { %v2863_v15 = vadd.f32 %v2862_v22, %v2838_v32  ;;  %v2843_v61 = vmul.f32 %v2827_v56, %v2827_v56  ;;  %v2848_v21 = vmul.f32 %v5140_v41, %v5140_v41  ;;  %v2845_v52 = vmul.f32 %v2829_v63, %v2829_v63  ;;  %v2602_v32 = vld [vmem:[#allocation11] sm:$0x3]  ;;  %v2603_v22 = vld [vmem:[#allocation13] sm:$0x3] }
 0x8ba   :  { %v2851_v18 = vadd.f32 %v2850_v11, %v2839_v42  ;;  %v2847_v12 = vmul.f32 %v2831_v48, %v2831_v48 }
 0x8bb   :  { %v2864_v55 = vadd.f32 %v2863_v15, %v2840_v38  ;;  %v3050_v38 = vrot.slane %v2602_v32, %v4144_v33  ;;  %v3077_v15 = vrot.slane %v2603_v22, %v4144_v33 }
 0x8bc   :  { %v2852_v35 = vadd.f32 %v2851_v18, %v2841_v20 }
 0x8bd   :  { %v2865_v44 = vadd.f32 %v2864_v55, %v2842_v8 }
 0x8be   :  { %v2853_v2 = vadd.f32 %v2852_v35, %v2843_v61 }
 0x8bf   :  { %v2866_v54 = vadd.f32 %v2865_v44, %v2844_v28 }
 0x8c0   :  { %v2854_v47 = vadd.f32 %v2853_v2, %v2845_v52 }
 0x8c1   :  { %v2867_v23 = vadd.f32 %v2866_v54, %v2846_v45 }
 0x8c2   :  { %v2855_v49 = vadd.f32 %v2854_v47, %v2847_v12 }
 0x8c3   :  { %v2868_v0 = vadd.f32 %v2867_v23, %v2848_v21 }
 0x8c4   :  { %v2856_v14 = vrot.slane %v2855_v49, 4 }
 0x8c5   :  { %v2869_v39 = vrot.slane %v2868_v0, 4 }
 0x8c6   :  { %v2857_v10 = vadd.f32 %v2856_v14, %v2855_v49 }
 0x8c7   :  { %v2870_v31 = vadd.f32 %v2869_v39, %v2868_v0 }
 0x8c8   :  { %v2858_v1 = vrot.slane %v2857_v10, 2 }
 0x8c9   :  { %v2871_v19 = vrot.slane %v2870_v31, 2 }
 0x8ca   :  { %v2859_v37 = vadd.f32 %v2858_v1, %v2857_v10  ;;  %v3054_v10 = vrot.slane %v2602_v32, %v5258_v24 }
 0x8cb   :  { %v2872_v26 = vadd.f32 %v2871_v19, %v2870_v31 }
 0x8cc   :  { %v2860_v30 = vrot.slane %v2859_v37, 1 }
 0x8cd   :  { %v2873_v53 = vrot.slane %v2872_v26, 1 }
 0x8ce   :  { %v2861_v25 = vadd.f32 %v2860_v30, %v2859_v37 }
 0x8cf   :  { %v2874_v60 = vadd.f32 %v2873_v53, %v2872_v26 }
 0x8d1   :  { %2939 = vmatprep.mubr.f32.mxu1 %v2874_v60 }
 0x8d2   :  { %2940 = vmatmul.mubr.f32.vlgmr.msra.gmra.mxu1 %v2861_v25 }
 0x992   :  { %v3425_v17 = vpop.f32.mrf.mxu1 }
 0x994   :  { %v3426_v57 = vpop.f32.mrf.mxu1 }
 0x995   :  { %v3427_v40 = vadd.f32 %v3426_v57, %v3425_v17 }
 0x997   :  { %v2945_v59 = vmul.f32 0.00048828125, %v3427_v40 }
 0x999   :  { %v2946_v13 = vadd.f32 1e-05, %v2945_v59 }
 0x99b   :  { %3639 = vrsqrt.f32 %v2946_v13 }
 0x9a8   :  { %v3640_v27 = vpop.eup %3639 }
 0x9a9   :  { %3281 = vmatmul.mubr.msk.f32.vlgmr.msra.gmra.mxu0 %vm944_vm9, %v3640_v27 }
 0xa69   :  { %v3017_v36 = vpop.f32.mrf.mxu0 }
 0xa6a   :  { %v3025_v7 = vrot.slane %v3017_v36, %v4144_v33 }
 0xa6c   :  { %v3030_v46 = vmul.f32 %v3025_v7, %v5088_v43  ;;  %v3032_v29 = vmul.f32 %v3025_v7, %v5091_v62  ;;  %v3034_v8 = vmul.f32 %v3025_v7, %v5110_v58  ;;  %v3036_v55 = vmul.f32 %v3025_v7, %v5116_v16 }
 0xa6d   :  { %v3038_v42 = vmul.f32 %v3025_v7, %v2825_v5  ;;  %v3040_v11 = vmul.f32 %v3025_v7, %v2827_v56  ;;  %v3042_v28 = vmul.f32 %v3025_v7, %v2829_v63  ;;  %v3044_v44 = vmul.f32 %v3025_v7, %v2831_v48  ;;  %v3019_v5 = vpop.f32.mrf.mxu0 }
 0xa6e   :  { %v3057_v20 = vmul.f32 %v3050_v38, %v3030_v46  ;;  %v3059_v18 = vmul.f32 %v3050_v38, %v3032_v29  ;;  %v3061_v45 = vmul.f32 %v3050_v38, %v3034_v8  ;;  %v3063_v54 = vmul.f32 %v3050_v38, %v3036_v55 }
 0xa6f   :  { %v3065_v61 = vmul.f32 %v3050_v38, %v3038_v42  ;;  %v3067_v35 = vmul.f32 %v3050_v38, %v3040_v11  ;;  %v3069_v21 = vmul.f32 %v3050_v38, %v3042_v28  ;;  %v3071_v23 = vmul.f32 %v3050_v38, %v3044_v44 }
 0xa70   :  { %v3084_v52 = vadd.f32 %v3077_v15, %v3057_v20  ;;  %v3086_v43 = vadd.f32 %v3077_v15, %v3059_v18  ;;  %v3088_v2 = vadd.f32 %v3077_v15, %v3061_v45  ;;  %v3090_v62 = vadd.f32 %v3077_v15, %v3063_v54 }
 0xa71   :  { %v3092_v0 = vadd.f32 %v3077_v15, %v3065_v61  ;;  %v3094_v58 = vadd.f32 %v3077_v15, %v3067_v35  ;;  %v3096_v12 = vadd.f32 %v3077_v15, %v3069_v21  ;;  %v3098_v16 = vadd.f32 %v3077_v15, %v3071_v23 }
 0xa72   :  { %v3100_v56 = vmax.f32 %v3084_v52, 0.0  ;;  %v3102_v63 = vmax.f32 %v3086_v43, 0.0  ;;  %v3104_v48 = vmax.f32 %v3088_v2, 0.0  ;;  %v3106_v47 = vmax.f32 %v3090_v62, 0.0 }
 0xa73   :  { %v3108_v39 = vmax.f32 %v3092_v0, 0.0  ;;  %v3110_v49 = vmax.f32 %v3094_v58, 0.0  ;;  %v3112_v31 = vmax.f32 %v3096_v12, 0.0  ;;  %v3114_v14 = vmax.f32 %v3098_v16, 0.0 }
 0xa74   :  { %3116 = vst [vmem:[%s5229_s12] sm:$0xff] %v3100_v56  ;;  %3118 = vst [vmem:[%s5229_s12 + $0x10] sm:$0xff] %v3102_v63  ;;  %v3029_v19 = vrot.slane %v3019_v5, %v4144_v33  ;;  %v3081_v33 = vrot.slane %v2603_v22, %v5258_v24 }
 0xa75   :  { %3120 = vst [vmem:[%s5229_s12 + $0x20] sm:$0xff] %v3104_v48  ;;  %3122 = vst [vmem:[%s5229_s12 + $0x30] sm:$0xff] %v3106_v47 }
 0xa76   :  { %3124 = vst [vmem:[%s5229_s12 + $0x40] sm:$0xff] %v3108_v39  ;;  %3126 = vst [vmem:[%s5229_s12 + $0x50] sm:$0xff] %v3110_v49  ;;  %v3031_v26 = vmul.f32 %v3029_v19, %v5094_v4  ;;  %v3033_v1 = vmul.f32 %v3029_v19, %v5097_v9  ;;  %v3035_v53 = vmul.f32 %v3029_v19, %v5100_v51 }
 0xa77   :  { %3128 = vst [vmem:[%s5229_s12 + $0x60] sm:$0xff] %v3112_v31  ;;  %3130 = vst [vmem:[%s5229_s12 + $0x70] sm:$0xff] %v3114_v14  ;;  %v3037_v37 = vmul.f32 %v3029_v19, %v5103_v3  ;;  %v3039_v60 = vmul.f32 %v3029_v19, %v5113_v50  ;;  %v3041_v30 = vmul.f32 %v3029_v19, %v5125_v34 }
 0xa78   :  { %v3043_v25 = vmul.f32 %v3029_v19, %v5133_v6  ;;  %v3045_v17 = vmul.f32 %v3029_v19, %v5140_v41  ;;  %v3058_v57 = vmul.f32 %v3054_v10, %v3031_v26  ;;  %v3060_v40 = vmul.f32 %v3054_v10, %v3033_v1 }
 0xa79   :  { %v3062_v59 = vmul.f32 %v3054_v10, %v3035_v53  ;;  %v3064_v24 = vmul.f32 %v3054_v10, %v3037_v37  ;;  %v3066_v13 = vmul.f32 %v3054_v10, %v3039_v60  ;;  %v3068_v4 = vmul.f32 %v3054_v10, %v3041_v30 }
 0xa7a   :  { %v3070_v27 = vmul.f32 %v3054_v10, %v3043_v25  ;;  %v3072_v9 = vmul.f32 %v3054_v10, %v3045_v17  ;;  %v3085_v32 = vadd.f32 %v3081_v33, %v3058_v57  ;;  %v3087_v51 = vadd.f32 %v3081_v33, %v3060_v40 }
 0xa7b   :  { %v3089_v22 = vadd.f32 %v3081_v33, %v3062_v59  ;;  %v3091_v3 = vadd.f32 %v3081_v33, %v3064_v24  ;;  %v3093_v36 = vadd.f32 %v3081_v33, %v3066_v13  ;;  %v3095_v50 = vadd.f32 %v3081_v33, %v3068_v4 }
 0xa7c   :  { %v3097_v7 = vadd.f32 %v3081_v33, %v3070_v27  ;;  %v3099_v34 = vadd.f32 %v3081_v33, %v3072_v9  ;;  %v3101_v38 = vmax.f32 %v3085_v32, 0.0  ;;  %v3103_v6 = vmax.f32 %v3087_v51, 0.0 }
 0xa7d   :  { %v3105_v15 = vmax.f32 %v3089_v22, 0.0  ;;  %v3107_v41 = vmax.f32 %v3091_v3, 0.0  ;;  %v3109_v46 = vmax.f32 %v3093_v36, 0.0  ;;  %v3111_v29 = vmax.f32 %v3095_v50, 0.0 }
 0xa7e   :  { %v3113_v8 = vmax.f32 %v3097_v7, 0.0  ;;  %v3115_v55 = vmax.f32 %v3099_v34, 0.0  ;;  %3117 = vst [vmem:[%s5229_s12 + $0x8] sm:$0xff] %v3101_v38  ;;  %3119 = vst [vmem:[%s5229_s12 + $0x18] sm:$0xff] %v3103_v6 }
 0xa7f   :  { %3121 = vst [vmem:[%s5229_s12 + $0x28] sm:$0xff] %v3105_v15  ;;  %3123 = vst [vmem:[%s5229_s12 + $0x38] sm:$0xff] %v3107_v41 }
 0xa80   :  { %3125 = vst [vmem:[%s5229_s12 + $0x48] sm:$0xff] %v3109_v46  ;;  %3127 = vst [vmem:[%s5229_s12 + $0x58] sm:$0xff] %v3111_v29 }
 0xa81   :  { %3129 = vst [vmem:[%s5229_s12 + $0x68] sm:$0xff] %v3113_v8  ;;  %3131 = vst [vmem:[%s5229_s12 + $0x78] sm:$0xff] %v3115_v55 }
 0xa82   :  { %3136 = vsyncpa [#allocation7], 1 }
 0xa83   :  { %3137 = vsyncpa [#allocation9], 1 }
 0xa84   :  { %3138 = vsyncpa [#allocation12], 1 }
 0xa85   :  { %3139 = vsyncpa [#allocation15], 1 }

</bundles_post_ra>
